<compile_context>
chip_gen: v6e
topology: v6e:2x2x1
jax: 0.10.0
libtpu: 0.0.40
codegen_flags: <defaults>
</compile_context>

<pallas_src>
import functools
import numpy as np
import jax
import jax.numpy as jnp
from jax.experimental import pallas as pl
from jax.experimental.pallas import tpu as pltpu


def _layernorm(x, gamma, beta, eps=1e-5):
    mu = jnp.mean(x, axis=-1, keepdims=True)
    var = jnp.mean((x - mu) ** 2, axis=-1, keepdims=True)
    return (x - mu) * jax.lax.rsqrt(var + eps) * gamma + beta


def encoder_layer_kernel(num_heads, seq_len,
                         x_ref, wqkv_ref, bqkv_ref, wo_ref, bo_ref,
                         g1_ref, be1_ref, w1_ref, b1_ref, w2_ref, b2_ref,
                         g2_ref, be2_ref, o_ref, x_scr):
    l = pl.program_id(1)
    num_layers = pl.num_programs(1)
    M, D = x_ref.shape                       # M = block_b * S  (rows folded)
    H, S = num_heads, seq_len
    hd = D // H
    b_blk = M // S

    # Layer 0: load this batch-block's activations into the VMEM carry.
    @pl.when(l == 0)
    def _():
        x_scr[...] = x_ref[...]

    x = x_scr[...]                           # (M, D) f32 residual stream
    xb = x.astype(jnp.bfloat16)

    # ---- fused QKV projection: one dense (M,D)x(D,3D) GEMM (full MXU width).
    # The 1/sqrt(hd) scale is folded into the Q columns/bias at pack time.
    qkv = jnp.dot(xb, wqkv_ref[...],
                  preferred_element_type=jnp.float32) + bqkv_ref[...]

    # ---- split heads into a (H * b_blk) batch axis for batched attention.
    def split_heads(z):
        cols = [qkv[:, z * D + h * hd:z * D + (h + 1) * hd] for h in range(H)]
        t = jnp.stack(cols, axis=0)          # (H, M, hd)
        return t.reshape(H * b_blk, S, hd).astype(jnp.bfloat16)

    qh, kh, vh = split_heads(0), split_heads(1), split_heads(2)

    # ---- attention (full softmax; S is small here).
    # TODO(synk): for long sequences tile the KV axis with an online softmax
    # instead of materializing the (H*b_blk, S, S) score tensor in VMEM.
    s = jnp.einsum('gqd,gkd->gqk', qh, kh, preferred_element_type=jnp.float32)
    s = s - jnp.max(s, axis=-1, keepdims=True)
    p = jnp.exp(s)
    p = p * pl.reciprocal(jnp.sum(p, axis=-1, keepdims=True), approx=True)
    ctx = jnp.einsum('gqk,gkd->gqd', p.astype(jnp.bfloat16), vh,
                     preferred_element_type=jnp.float32)    # (H*b_blk, S, hd)

    # ---- merge heads back to (M, D); dense output projection.
    ctx = ctx.reshape(H, M, hd)
    att = jnp.concatenate([ctx[h] for h in range(H)], axis=-1)   # (M, D)
    att = jnp.dot(att.astype(jnp.bfloat16), wo_ref[...],
                  preferred_element_type=jnp.float32) + bo_ref[...]

    # ---- residual + layernorm 1
    x = _layernorm(x + att, g1_ref[...], be1_ref[...])

    # ---- FFN: Linear -> ReLU -> (Dropout = identity) -> Linear
    h1 = jnp.dot(x.astype(jnp.bfloat16), w1_ref[...],
                 preferred_element_type=jnp.float32) + b1_ref[...]
    h1 = jnp.maximum(h1, 0.0)
    # TODO(synk): nn.Dropout(0.1) treated as identity (eval-mode semantics).
    ffn = jnp.dot(h1.astype(jnp.bfloat16), w2_ref[...],
                  preferred_element_type=jnp.float32) + b2_ref[...]

    # ---- residual + layernorm 2; carry to the next layer step.
    x = _layernorm(x + ffn, g2_ref[...], be2_ref[...])
    x_scr[...] = x

    @pl.when(l == num_layers - 1)
    def _():
        o_ref[...] = x


def pack_layer_params(layers, num_heads):
    """Stack per-layer weights along a leading L axis, fuse QKV, fold the
    1/sqrt(head_dim) scale into the Q weights/bias, and cast matmul weights
    to bf16.  Biases / layernorm params stay f32."""
    D = layers[0][0].shape[0]
    hd = D // num_heads
    scale = 1.0 / float(np.sqrt(hd))

    acc = {k: [] for k in ("wqkv", "bqkv", "wo", "bo", "g1", "be1",
                           "w1", "b1", "w2", "b2", "g2", "be2")}
    for (wq, bq, wk, bk, wv, bv, wo, bo,
         g1, be1, w1, b1, w2, b2, g2, be2) in layers:
        acc["wqkv"].append(jnp.concatenate([wq * scale, wk, wv], axis=1))
        acc["bqkv"].append(jnp.concatenate([bq * scale, bk, bv], axis=1))
        acc["wo"].append(wo); acc["bo"].append(bo)
        acc["g1"].append(g1); acc["be1"].append(be1)
        acc["w1"].append(w1); acc["b1"].append(b1)
        acc["w2"].append(w2); acc["b2"].append(b2)
        acc["g2"].append(g2); acc["be2"].append(be2)

    st = lambda xs: jnp.stack(xs, axis=0)
    bf = lambda x: x.astype(jnp.bfloat16)
    return {
        "wqkv": bf(st(acc["wqkv"])), "bqkv": st(acc["bqkv"]),
        "wo": bf(st(acc["wo"])), "bo": st(acc["bo"]),
        "g1": st(acc["g1"]), "be1": st(acc["be1"]),
        "w1": bf(st(acc["w1"])), "b1": st(acc["b1"]),
        "w2": bf(st(acc["w2"])), "b2": st(acc["b2"]),
        "g2": st(acc["g2"]), "be2": st(acc["be2"]),
    }


def _choose_block_b(batch, seq, target_rows=256, max_rows=2048):
    """Largest divisor of `batch` whose row count (Bblk*S) stays VMEM-sane,
    preferring at least `target_rows` rows per GEMM for MXU fill."""
    best = 1
    for cand in range(1, batch + 1):
        if batch % cand != 0:
            continue
        if cand * seq > max_rows:
            break
        best = cand
        if cand * seq >= target_rows:
            break
    return best


def run_encoder(x, packed, num_heads, num_layers, block_b=None):
    B, S, D = x.shape
    if block_b is None:
        block_b = _choose_block_b(B, S)
    assert B % block_b == 0
    n_bb = B // block_b
    M = block_b * S

    order = ("wqkv", "bqkv", "wo", "bo", "g1", "be1",
             "w1", "b1", "w2", "b2", "g2", "be2")
    weights = [packed[k] for k in order]

    # Per-layer weight blocks: leading layer dim squeezed, indexed by the
    # 'arbitrary' layer grid axis -> default double buffering prefetches the
    # next layer's weights while the current layer computes.
    def layer_spec(arr):
        nd = arr.ndim
        return pl.BlockSpec((None,) + arr.shape[1:],
                            lambda b, l, _nd=nd: (l,) + (0,) * (_nd - 1))
    weight_specs = [layer_spec(w) for w in weights]

    x2d = x.reshape(B * S, D)   # fold batch rows into the GEMM M dimension

    # VMEM budget: 2x per-layer weights (streamed, double-buffered) +
    # activation block / carry / intermediates, with headroom.
    per_layer = sum(int(np.prod(w.shape[1:])) * w.dtype.itemsize
                    for w in weights)
    inter = (M * 3 * D + 2 * num_heads * block_b * S * S
             + M * 4 * D + 4 * M * D) * 4
    need = 2 * per_layer + inter
    vmem_limit = int(min(100 * 2**20, max(32 * 2**20, int(need * 1.5))))

    out = pl.pallas_call(
        functools.partial(encoder_layer_kernel, num_heads, S),
        out_shape=jax.ShapeDtypeStruct((B * S, D), jnp.float32),
        grid=(n_bb, num_layers),
        in_specs=[pl.BlockSpec((M, D), lambda b, l: (b, 0))] + weight_specs,
        out_specs=pl.BlockSpec((M, D), lambda b, l: (b, 0)),
        scratch_shapes=[pltpu.VMEM((M, D), jnp.float32)],   # residual carry
        compiler_params=pltpu.CompilerParams(
            # batch-block axis parallel (v7x 2-TC sharding; neutral v5e/v6e),
            # layer axis arbitrary (sequential carry / accumulator pattern).
            dimension_semantics=("parallel", "arbitrary"),
            vmem_limit_bytes=vmem_limit,
        ),
    )(x2d, *weights)
    return out.reshape(B, S, D)


def contract_encoder_forward(token_ids, params, num_heads):
    # glue: embedding gather + positional encoding (plain JAX)
    S = token_ids.shape[1]
    x = params["embedding"][token_ids] + params["pos"][:S][None, :, :]
    x = x.astype(jnp.float32)
    packed = pack_layer_params(params["layers"], num_heads)
    return run_encoder(x, packed, num_heads, len(params["layers"]))


def init_params(key, vocab_size, embed_dim, num_layers):
    ks = jax.random.split(key, 2 + num_layers)
    params = {
        "embedding": jax.random.normal(ks[0], (vocab_size, embed_dim), jnp.float32) * 0.1,
        "pos": jax.random.normal(ks[1], (1000, embed_dim), jnp.float32) * 0.1,
        "layers": [],
    }
    D = embed_dim

    def lin(k, din, dout):
        kw, kb = jax.random.split(k)
        w = jax.random.normal(kw, (din, dout), jnp.float32) * 0.05
        b = jax.random.normal(kb, (1, dout), jnp.float32) * 0.05
        return w, b

    for i in range(num_layers):
        lk = jax.random.split(ks[2 + i], 6)
        wq, bq = lin(lk[0], D, D)
        wk, bk = lin(lk[1], D, D)
        wv, bv = lin(lk[2], D, D)
        wo, bo = lin(lk[3], D, D)
        w1, b1 = lin(lk[4], D, 4 * D)
        w2, b2 = lin(lk[5], 4 * D, D)
        g1 = jnp.ones((1, D), jnp.float32); be1 = jnp.zeros((1, D), jnp.float32)
        g2 = jnp.ones((1, D), jnp.float32); be2 = jnp.zeros((1, D), jnp.float32)
        params["layers"].append([wq, bq, wk, bk, wv, bv, wo, bo,
                                 g1, be1, w1, b1, w2, b2, g2, be2])
    return params


def reference_forward(token_ids, params, num_heads):
    """Pure-JAX f32 reference matching the PyTorch forward (dropout = identity)."""
    S = token_ids.shape[1]
    x = params["embedding"][token_ids] + params["pos"][:S][None, :, :]
    for (wq, bq, wk, bk, wv, bv, wo, bo,
         g1, be1, w1, b1, w2, b2, g2, be2) in params["layers"]:
        B, S, D = x.shape
        hd = D // num_heads
        q = (x @ wq + bq).reshape(B, S, num_heads, hd).transpose(0, 2, 1, 3)
        k = (x @ wk + bk).reshape(B, S, num_heads, hd).transpose(0, 2, 1, 3)
        v = (x @ wv + bv).reshape(B, S, num_heads, hd).transpose(0, 2, 1, 3)
        s = (q @ k.transpose(0, 1, 3, 2)) / np.sqrt(hd)
        a = jax.nn.softmax(s, axis=-1)
        att = (a @ v).transpose(0, 2, 1, 3).reshape(B, S, D)
        att = att @ wo + bo
        x = _layernorm(x + att, g1, be1)
        ffn = jnp.maximum(x @ w1 + b1, 0.0) @ w2 + b2
        x = _layernorm(x + ffn, g2, be2)
    return x


if __name__ == "__main__":
    VOCAB, EMBED_DIM, NUM_HEADS, NUM_LAYERS = 100, 32, 8, 2
    B, S = 2, 8

    key = jax.random.PRNGKey(0)
    pkey, ikey = jax.random.split(key)
    params = init_params(pkey, VOCAB, EMBED_DIM, NUM_LAYERS)
    token_ids = jax.random.randint(ikey, (B, S), 0, VOCAB, dtype=jnp.int32)

    out = contract_encoder_forward(token_ids, params, NUM_HEADS)
    out = jax.block_until_ready(out)

    ref = reference_forward(token_ids, params, NUM_HEADS)
    # bf16 MXU operands (f32 accumulation) -> loosened tolerance vs f32 reference.
    np.testing.assert_allclose(np.asarray(out), np.asarray(ref),
                               atol=5e-2, rtol=5e-2)
    print("KERNEL_OK")
</pallas_src>

<mosaic_0001>
module attributes {stable_mosaic.version = 11 : i64} {
  func.func @encoder_layer_kernel(%arg0: i32, %arg1: i32, %arg2: memref<16x32xf32, #tpu.memory_space<vmem>>, %arg3: memref<1x32x96xbf16, #tpu.memory_space<vmem>>, %arg4: memref<1x1x96xf32, #tpu.memory_space<vmem>>, %arg5: memref<1x32x32xbf16, #tpu.memory_space<vmem>>, %arg6: memref<1x1x32xf32, #tpu.memory_space<vmem>>, %arg7: memref<1x1x32xf32, #tpu.memory_space<vmem>>, %arg8: memref<1x1x32xf32, #tpu.memory_space<vmem>>, %arg9: memref<1x32x128xbf16, #tpu.memory_space<vmem>>, %arg10: memref<1x1x128xf32, #tpu.memory_space<vmem>>, %arg11: memref<1x128x32xbf16, #tpu.memory_space<vmem>>, %arg12: memref<1x1x32xf32, #tpu.memory_space<vmem>>, %arg13: memref<1x1x32xf32, #tpu.memory_space<vmem>>, %arg14: memref<1x1x32xf32, #tpu.memory_space<vmem>>, %arg15: memref<16x32xf32, #tpu.memory_space<vmem>>, %arg16: memref<16x32xf32, #tpu.memory_space<vmem>>) attributes {dimension_semantics = [#tpu.dimension_semantics<parallel>, #tpu.dimension_semantics<arbitrary>], iteration_bounds = array<i64: 1, 2>, scalar_prefetch = 0 : i64, scratch_operands = 1 : i64, tpu.core_type = #tpu.core_type<tc>, window_params = [{transform_indices = @transform_0, window_bounds = array<i64: 16, 32>}, {transform_indices = @transform_1, window_bounds = array<i64: 1, 32, 96>}, {transform_indices = @transform_2, window_bounds = array<i64: 1, 1, 96>}, {transform_indices = @transform_3, window_bounds = array<i64: 1, 32, 32>}, {transform_indices = @transform_4, window_bounds = array<i64: 1, 1, 32>}, {transform_indices = @transform_5, window_bounds = array<i64: 1, 1, 32>}, {transform_indices = @transform_6, window_bounds = array<i64: 1, 1, 32>}, {transform_indices = @transform_7, window_bounds = array<i64: 1, 32, 128>}, {transform_indices = @transform_8, window_bounds = array<i64: 1, 1, 128>}, {transform_indices = @transform_9, window_bounds = array<i64: 1, 128, 32>}, {transform_indices = @transform_10, window_bounds = array<i64: 1, 1, 32>}, {transform_indices = @transform_11, window_bounds = array<i64: 1, 1, 32>}, {transform_indices = @transform_12, window_bounds = array<i64: 1, 1, 32>}, {transform_indices = @transform_13, window_bounds = array<i64: 16, 32>}]} {
    %c0_i32 = arith.constant 0 : i32
    %0 = arith.cmpi eq, %arg1, %c0_i32 : i32
    %1 = arith.extui %0 : i1 to i32
    %c0_i32_0 = arith.constant 0 : i32
    %2 = arith.cmpi ne, %1, %c0_i32_0 : i32
    scf.if %2 {
      %c0_59 = arith.constant 0 : index
      %c0_60 = arith.constant 0 : index
      %184 = vector.load %arg2[%c0_59, %c0_60] : memref<16x32xf32, #tpu.memory_space<vmem>>, vector<16x32xf32>
      %c0_61 = arith.constant 0 : index
      %c0_62 = arith.constant 0 : index
      %185 = vector.load %arg16[%c0_61, %c0_62] : memref<16x32xf32, #tpu.memory_space<vmem>>, vector<16x32xf32>
      tpu.vector_store %arg16[%c0_61, %c0_62], %184 {strides = array<i32>} : memref<16x32xf32, #tpu.memory_space<vmem>>, vector<16x32xf32>,
    } else {
    }
    %c0 = arith.constant 0 : index
    %c0_1 = arith.constant 0 : index
    %3 = vector.load %arg16[%c0, %c0_1] : memref<16x32xf32, #tpu.memory_space<vmem>>, vector<16x32xf32>
    %4 = arith.truncf %3 : vector<16x32xf32> to vector<16x32xbf16>
    %c0_2 = arith.constant 0 : index
    %c0_3 = arith.constant 0 : index
    %c0_4 = arith.constant 0 : index
    %5 = vector.load %arg3[%c0_2, %c0_3, %c0_4] : memref<1x32x96xbf16, #tpu.memory_space<vmem>>, vector<1x32x96xbf16>
    %6 = vector.shape_cast %5 : vector<1x32x96xbf16> to vector<32x96xbf16>
    %cst = arith.constant dense<0.000000e+00> : vector<16x96xf32>
    %7 = tpu.matmul %4, %6, %cst {dimension_numbers = #tpu.dot_dimension_numbers<[1], [0], [0], [1], [0, 0, 1, 1], [], []>} : vector<16x32xbf16>, vector<32x96xbf16>, vector<16x96xf32> -> vector<16x96xf32>
    %c0_5 = arith.constant 0 : index
    %c0_6 = arith.constant 0 : index
    %c0_7 = arith.constant 0 : index
    %8 = vector.load %arg4[%c0_5, %c0_6, %c0_7] : memref<1x1x96xf32, #tpu.memory_space<vmem>>, vector<1x1x96xf32>
    %9 = vector.shape_cast %8 : vector<1x1x96xf32> to vector<1x96xf32>
    %10 = vector.broadcast %9 : vector<1x96xf32> to vector<16x96xf32>
    %11 = arith.addf %7, %10 : vector<16x96xf32>
    %12 = vector.extract_strided_slice %11 {offsets = [0, 0], sizes = [16, 4], strides = [1, 1]} : vector<16x96xf32> to vector<16x4xf32>
    %13 = vector.extract_strided_slice %11 {offsets = [0, 4], sizes = [16, 4], strides = [1, 1]} : vector<16x96xf32> to vector<16x4xf32>
    %14 = vector.extract_strided_slice %11 {offsets = [0, 8], sizes = [16, 4], strides = [1, 1]} : vector<16x96xf32> to vector<16x4xf32>
    %15 = vector.extract_strided_slice %11 {offsets = [0, 12], sizes = [16, 4], strides = [1, 1]} : vector<16x96xf32> to vector<16x4xf32>
    %16 = vector.extract_strided_slice %11 {offsets = [0, 16], sizes = [16, 4], strides = [1, 1]} : vector<16x96xf32> to vector<16x4xf32>
    %17 = vector.extract_strided_slice %11 {offsets = [0, 20], sizes = [16, 4], strides = [1, 1]} : vector<16x96xf32> to vector<16x4xf32>
    %18 = vector.extract_strided_slice %11 {offsets = [0, 24], sizes = [16, 4], strides = [1, 1]} : vector<16x96xf32> to vector<16x4xf32>
    %19 = vector.extract_strided_slice %11 {offsets = [0, 28], sizes = [16, 4], strides = [1, 1]} : vector<16x96xf32> to vector<16x4xf32>
    %20 = vector.shape_cast %12 : vector<16x4xf32> to vector<1x16x4xf32>
    %21 = vector.shape_cast %13 : vector<16x4xf32> to vector<1x16x4xf32>
    %22 = vector.shape_cast %14 : vector<16x4xf32> to vector<1x16x4xf32>
    %23 = vector.shape_cast %15 : vector<16x4xf32> to vector<1x16x4xf32>
    %24 = vector.shape_cast %16 : vector<16x4xf32> to vector<1x16x4xf32>
    %25 = vector.shape_cast %17 : vector<16x4xf32> to vector<1x16x4xf32>
    %26 = vector.shape_cast %18 : vector<16x4xf32> to vector<1x16x4xf32>
    %27 = vector.shape_cast %19 : vector<16x4xf32> to vector<1x16x4xf32>
    %28 = tpu.concatenate %20, %21, %22, %23, %24, %25, %26, %27 in 0 : vector<1x16x4xf32>, vector<1x16x4xf32>, vector<1x16x4xf32>, vector<1x16x4xf32>, vector<1x16x4xf32>, vector<1x16x4xf32>, vector<1x16x4xf32>, vector<1x16x4xf32> -> vector<8x16x4xf32>
    %29 = vector.shape_cast %28 : vector<8x16x4xf32> to vector<16x8x4xf32>
    %30 = arith.truncf %29 : vector<16x8x4xf32> to vector<16x8x4xbf16>
    %31 = vector.extract_strided_slice %11 {offsets = [0, 32], sizes = [16, 4], strides = [1, 1]} : vector<16x96xf32> to vector<16x4xf32>
    %32 = vector.extract_strided_slice %11 {offsets = [0, 36], sizes = [16, 4], strides = [1, 1]} : vector<16x96xf32> to vector<16x4xf32>
    %33 = vector.extract_strided_slice %11 {offsets = [0, 40], sizes = [16, 4], strides = [1, 1]} : vector<16x96xf32> to vector<16x4xf32>
    %34 = vector.extract_strided_slice %11 {offsets = [0, 44], sizes = [16, 4], strides = [1, 1]} : vector<16x96xf32> to vector<16x4xf32>
    %35 = vector.extract_strided_slice %11 {offsets = [0, 48], sizes = [16, 4], strides = [1, 1]} : vector<16x96xf32> to vector<16x4xf32>
    %36 = vector.extract_strided_slice %11 {offsets = [0, 52], sizes = [16, 4], strides = [1, 1]} : vector<16x96xf32> to vector<16x4xf32>
    %37 = vector.extract_strided_slice %11 {offsets = [0, 56], sizes = [16, 4], strides = [1, 1]} : vector<16x96xf32> to vector<16x4xf32>
    %38 = vector.extract_strided_slice %11 {offsets = [0, 60], sizes = [16, 4], strides = [1, 1]} : vector<16x96xf32> to vector<16x4xf32>
    %39 = vector.shape_cast %31 : vector<16x4xf32> to vector<1x16x4xf32>
    %40 = vector.shape_cast %32 : vector<16x4xf32> to vector<1x16x4xf32>
    %41 = vector.shape_cast %33 : vector<16x4xf32> to vector<1x16x4xf32>
    %42 = vector.shape_cast %34 : vector<16x4xf32> to vector<1x16x4xf32>
    %43 = vector.shape_cast %35 : vector<16x4xf32> to vector<1x16x4xf32>
    %44 = vector.shape_cast %36 : vector<16x4xf32> to vector<1x16x4xf32>
    %45 = vector.shape_cast %37 : vector<16x4xf32> to vector<1x16x4xf32>
    %46 = vector.shape_cast %38 : vector<16x4xf32> to vector<1x16x4xf32>
    %47 = tpu.concatenate %39, %40, %41, %42, %43, %44, %45, %46 in 0 : vector<1x16x4xf32>, vector<1x16x4xf32>, vector<1x16x4xf32>, vector<1x16x4xf32>, vector<1x16x4xf32>, vector<1x16x4xf32>, vector<1x16x4xf32>, vector<1x16x4xf32> -> vector<8x16x4xf32>
    %48 = vector.shape_cast %47 : vector<8x16x4xf32> to vector<16x8x4xf32>
    %49 = arith.truncf %48 : vector<16x8x4xf32> to vector<16x8x4xbf16>
    %50 = vector.extract_strided_slice %11 {offsets = [0, 64], sizes = [16, 4], strides = [1, 1]} : vector<16x96xf32> to vector<16x4xf32>
    %51 = vector.extract_strided_slice %11 {offsets = [0, 68], sizes = [16, 4], strides = [1, 1]} : vector<16x96xf32> to vector<16x4xf32>
    %52 = vector.extract_strided_slice %11 {offsets = [0, 72], sizes = [16, 4], strides = [1, 1]} : vector<16x96xf32> to vector<16x4xf32>
    %53 = vector.extract_strided_slice %11 {offsets = [0, 76], sizes = [16, 4], strides = [1, 1]} : vector<16x96xf32> to vector<16x4xf32>
    %54 = vector.extract_strided_slice %11 {offsets = [0, 80], sizes = [16, 4], strides = [1, 1]} : vector<16x96xf32> to vector<16x4xf32>
    %55 = vector.extract_strided_slice %11 {offsets = [0, 84], sizes = [16, 4], strides = [1, 1]} : vector<16x96xf32> to vector<16x4xf32>
    %56 = vector.extract_strided_slice %11 {offsets = [0, 88], sizes = [16, 4], strides = [1, 1]} : vector<16x96xf32> to vector<16x4xf32>
    %57 = vector.extract_strided_slice %11 {offsets = [0, 92], sizes = [16, 4], strides = [1, 1]} : vector<16x96xf32> to vector<16x4xf32>
    %58 = vector.shape_cast %50 : vector<16x4xf32> to vector<1x16x4xf32>
    %59 = vector.shape_cast %51 : vector<16x4xf32> to vector<1x16x4xf32>
    %60 = vector.shape_cast %52 : vector<16x4xf32> to vector<1x16x4xf32>
    %61 = vector.shape_cast %53 : vector<16x4xf32> to vector<1x16x4xf32>
    %62 = vector.shape_cast %54 : vector<16x4xf32> to vector<1x16x4xf32>
    %63 = vector.shape_cast %55 : vector<16x4xf32> to vector<1x16x4xf32>
    %64 = vector.shape_cast %56 : vector<16x4xf32> to vector<1x16x4xf32>
    %65 = vector.shape_cast %57 : vector<16x4xf32> to vector<1x16x4xf32>
    %66 = tpu.concatenate %58, %59, %60, %61, %62, %63, %64, %65 in 0 : vector<1x16x4xf32>, vector<1x16x4xf32>, vector<1x16x4xf32>, vector<1x16x4xf32>, vector<1x16x4xf32>, vector<1x16x4xf32>, vector<1x16x4xf32>, vector<1x16x4xf32> -> vector<8x16x4xf32>
    %67 = vector.shape_cast %66 : vector<8x16x4xf32> to vector<16x8x4xf32>
    %68 = arith.truncf %67 : vector<16x8x4xf32> to vector<16x8x4xbf16>
    "tpu.trace_start"() <{level = 10 : i32, message = "gqd,gkd->gqk"}> : () -> ()
    %cst_8 = arith.constant dense<0.000000e+00> : vector<16x8x8xf32>
    %69 = tpu.matmul %30, %49, %cst_8 {dimension_numbers = #tpu.dot_dimension_numbers<[2], [2], [1], [1], [0, 0, 0, 1, 1, 1], [0], [0]>} : vector<16x8x4xbf16>, vector<16x8x4xbf16>, vector<16x8x8xf32> -> vector<16x8x8xf32>
    "tpu.trace_stop"() : () -> ()
    %cst_9 = arith.constant dense<0xFF800000> : vector<16x8xf32>
    %70 = vector.multi_reduction <maximumf>, %69, %cst_9 [2] : vector<16x8x8xf32> to vector<16x8xf32>
    %71 = vector.shape_cast %70 : vector<16x8xf32> to vector<16x8x1xf32>
    %72 = vector.broadcast %71 : vector<16x8x1xf32> to vector<16x8x8xf32>
    %73 = arith.subf %69, %72 : vector<16x8x8xf32>
    %74 = math.exp %73 : vector<16x8x8xf32>
    %cst_10 = arith.constant dense<0.000000e+00> : vector<16x8xf32>
    %75 = vector.multi_reduction <add>, %74, %cst_10 [2] : vector<16x8x8xf32> to vector<16x8xf32>
    %76 = vector.shape_cast %75 : vector<16x8xf32> to vector<16x8x1xf32>
    %77 = tpu.reciprocal %76 {approx = true} : vector<16x8x1xf32> -> vector<16x8x1xf32>
    %78 = vector.broadcast %77 : vector<16x8x1xf32> to vector<16x8x8xf32>
    %79 = arith.mulf %74, %78 : vector<16x8x8xf32>
    %80 = arith.truncf %79 : vector<16x8x8xf32> to vector<16x8x8xbf16>
    "tpu.trace_start"() <{level = 10 : i32, message = "gqk,gkd->gqd"}> : () -> ()
    %cst_11 = arith.constant dense<0.000000e+00> : vector<16x8x4xf32>
    %81 = tpu.matmul %80, %68, %cst_11 {dimension_numbers = #tpu.dot_dimension_numbers<[2], [1], [1], [2], [0, 0, 0, 1, 1, 2], [0], [0]>} : vector<16x8x8xbf16>, vector<16x8x4xbf16>, vector<16x8x4xf32> -> vector<16x8x4xf32>
    "tpu.trace_stop"() : () -> ()
    %82 = vector.shape_cast %81 : vector<16x8x4xf32> to vector<8x16x4xf32>
    %83 = vector.extract_strided_slice %82 {offsets = [0, 0, 0], sizes = [1, 16, 4], strides = [1, 1, 1]} : vector<8x16x4xf32> to vector<1x16x4xf32>
    %84 = vector.shape_cast %83 : vector<1x16x4xf32> to vector<16x4xf32>
    %85 = vector.extract_strided_slice %82 {offsets = [1, 0, 0], sizes = [1, 16, 4], strides = [1, 1, 1]} : vector<8x16x4xf32> to vector<1x16x4xf32>
    %86 = vector.shape_cast %85 : vector<1x16x4xf32> to vector<16x4xf32>
    %87 = vector.extract_strided_slice %82 {offsets = [2, 0, 0], sizes = [1, 16, 4], strides = [1, 1, 1]} : vector<8x16x4xf32> to vector<1x16x4xf32>
    %88 = vector.shape_cast %87 : vector<1x16x4xf32> to vector<16x4xf32>
    %89 = vector.extract_strided_slice %82 {offsets = [3, 0, 0], sizes = [1, 16, 4], strides = [1, 1, 1]} : vector<8x16x4xf32> to vector<1x16x4xf32>
    %90 = vector.shape_cast %89 : vector<1x16x4xf32> to vector<16x4xf32>
    %91 = vector.extract_strided_slice %82 {offsets = [4, 0, 0], sizes = [1, 16, 4], strides = [1, 1, 1]} : vector<8x16x4xf32> to vector<1x16x4xf32>
    %92 = vector.shape_cast %91 : vector<1x16x4xf32> to vector<16x4xf32>
    %93 = vector.extract_strided_slice %82 {offsets = [5, 0, 0], sizes = [1, 16, 4], strides = [1, 1, 1]} : vector<8x16x4xf32> to vector<1x16x4xf32>
    %94 = vector.shape_cast %93 : vector<1x16x4xf32> to vector<16x4xf32>
    %95 = vector.extract_strided_slice %82 {offsets = [6, 0, 0], sizes = [1, 16, 4], strides = [1, 1, 1]} : vector<8x16x4xf32> to vector<1x16x4xf32>
    %96 = vector.shape_cast %95 : vector<1x16x4xf32> to vector<16x4xf32>
    %97 = vector.extract_strided_slice %82 {offsets = [7, 0, 0], sizes = [1, 16, 4], strides = [1, 1, 1]} : vector<8x16x4xf32> to vector<1x16x4xf32>
    %98 = vector.shape_cast %97 : vector<1x16x4xf32> to vector<16x4xf32>
    %99 = tpu.concatenate %84, %86, %88, %90, %92, %94, %96, %98 in 1 : vector<16x4xf32>, vector<16x4xf32>, vector<16x4xf32>, vector<16x4xf32>, vector<16x4xf32>, vector<16x4xf32>, vector<16x4xf32>, vector<16x4xf32> -> vector<16x32xf32>
    %100 = arith.truncf %99 : vector<16x32xf32> to vector<16x32xbf16>
    %c0_12 = arith.constant 0 : index
    %c0_13 = arith.constant 0 : index
    %c0_14 = arith.constant 0 : index
    %101 = vector.load %arg5[%c0_12, %c0_13, %c0_14] : memref<1x32x32xbf16, #tpu.memory_space<vmem>>, vector<1x32x32xbf16>
    %102 = vector.shape_cast %101 : vector<1x32x32xbf16> to vector<32x32xbf16>
    %cst_15 = arith.constant dense<0.000000e+00> : vector<16x32xf32>
    %103 = tpu.matmul %100, %102, %cst_15 {dimension_numbers = #tpu.dot_dimension_numbers<[1], [0], [0], [1], [0, 0, 1, 1], [], []>} : vector<16x32xbf16>, vector<32x32xbf16>, vector<16x32xf32> -> vector<16x32xf32>
    %c0_16 = arith.constant 0 : index
    %c0_17 = arith.constant 0 : index
    %c0_18 = arith.constant 0 : index
    %104 = vector.load %arg6[%c0_16, %c0_17, %c0_18] : memref<1x1x32xf32, #tpu.memory_space<vmem>>, vector<1x1x32xf32>
    %105 = vector.shape_cast %104 : vector<1x1x32xf32> to vector<1x32xf32>
    %106 = vector.broadcast %105 : vector<1x32xf32> to vector<16x32xf32>
    %107 = arith.addf %103, %106 : vector<16x32xf32>
    %108 = arith.addf %3, %107 : vector<16x32xf32>
    %c0_19 = arith.constant 0 : index
    %c0_20 = arith.constant 0 : index
    %c0_21 = arith.constant 0 : index
    %109 = vector.load %arg7[%c0_19, %c0_20, %c0_21] : memref<1x1x32xf32, #tpu.memory_space<vmem>>, vector<1x1x32xf32>
    %110 = vector.shape_cast %109 : vector<1x1x32xf32> to vector<1x32xf32>
    %c0_22 = arith.constant 0 : index
    %c0_23 = arith.constant 0 : index
    %c0_24 = arith.constant 0 : index
    %111 = vector.load %arg8[%c0_22, %c0_23, %c0_24] : memref<1x1x32xf32, #tpu.memory_space<vmem>>, vector<1x1x32xf32>
    %112 = vector.shape_cast %111 : vector<1x1x32xf32> to vector<1x32xf32>
    %cst_25 = arith.constant dense<0.000000e+00> : vector<16xf32>
    %113 = vector.multi_reduction <add>, %108, %cst_25 [1] : vector<16x32xf32> to vector<16xf32>
    %114 = vector.shape_cast %113 : vector<16xf32> to vector<16x1xf32>
    %cst_26 = arith.constant 3.200000e+01 : f32
    %115 = vector.broadcast %cst_26 : f32 to vector<16x1xf32>
    %116 = arith.divf %114, %115 : vector<16x1xf32>
    %117 = vector.broadcast %116 : vector<16x1xf32> to vector<16x32xf32>
    %118 = arith.subf %108, %117 : vector<16x32xf32>
    %119 = arith.mulf %118, %118 : vector<16x32xf32>
    %cst_27 = arith.constant dense<0.000000e+00> : vector<16xf32>
    %120 = vector.multi_reduction <add>, %119, %cst_27 [1] : vector<16x32xf32> to vector<16xf32>
    %121 = vector.shape_cast %120 : vector<16xf32> to vector<16x1xf32>
    %cst_28 = arith.constant 3.200000e+01 : f32
    %122 = vector.broadcast %cst_28 : f32 to vector<16x1xf32>
    %123 = arith.divf %121, %122 : vector<16x1xf32>
    %124 = vector.broadcast %116 : vector<16x1xf32> to vector<16x32xf32>
    %125 = arith.subf %108, %124 : vector<16x32xf32>
    %cst_29 = arith.constant 9.99999974E-6 : f32
    %126 = vector.broadcast %cst_29 : f32 to vector<16x1xf32>
    %127 = arith.addf %123, %126 : vector<16x1xf32>
    %128 = math.rsqrt %127 : vector<16x1xf32>
    %129 = vector.broadcast %128 : vector<16x1xf32> to vector<16x32xf32>
    %130 = arith.mulf %125, %129 : vector<16x32xf32>
    %131 = vector.broadcast %110 : vector<1x32xf32> to vector<16x32xf32>
    %132 = arith.mulf %130, %131 : vector<16x32xf32>
    %133 = vector.broadcast %112 : vector<1x32xf32> to vector<16x32xf32>
    %134 = arith.addf %132, %133 : vector<16x32xf32>
    %135 = arith.truncf %134 : vector<16x32xf32> to vector<16x32xbf16>
    %c0_30 = arith.constant 0 : index
    %c0_31 = arith.constant 0 : index
    %c0_32 = arith.constant 0 : index
    %136 = vector.load %arg9[%c0_30, %c0_31, %c0_32] : memref<1x32x128xbf16, #tpu.memory_space<vmem>>, vector<1x32x128xbf16>
    %137 = vector.shape_cast %136 : vector<1x32x128xbf16> to vector<32x128xbf16>
    %cst_33 = arith.constant dense<0.000000e+00> : vector<16x128xf32>
    %138 = tpu.matmul %135, %137, %cst_33 {dimension_numbers = #tpu.dot_dimension_numbers<[1], [0], [0], [1], [0, 0, 1, 1], [], []>} : vector<16x32xbf16>, vector<32x128xbf16>, vector<16x128xf32> -> vector<16x128xf32>
    %c0_34 = arith.constant 0 : index
    %c0_35 = arith.constant 0 : index
    %c0_36 = arith.constant 0 : index
    %139 = vector.load %arg10[%c0_34, %c0_35, %c0_36] : memref<1x1x128xf32, #tpu.memory_space<vmem>>, vector<1x1x128xf32>
    %140 = vector.shape_cast %139 : vector<1x1x128xf32> to vector<1x128xf32>
    %141 = vector.broadcast %140 : vector<1x128xf32> to vector<16x128xf32>
    %142 = arith.addf %138, %141 : vector<16x128xf32>
    %cst_37 = arith.constant 0.000000e+00 : f32
    %143 = vector.broadcast %cst_37 : f32 to vector<16x128xf32>
    %144 = arith.maximumf %142, %143 : vector<16x128xf32>
    %145 = arith.truncf %144 : vector<16x128xf32> to vector<16x128xbf16>
    %c0_38 = arith.constant 0 : index
    %c0_39 = arith.constant 0 : index
    %c0_40 = arith.constant 0 : index
    %146 = vector.load %arg11[%c0_38, %c0_39, %c0_40] : memref<1x128x32xbf16, #tpu.memory_space<vmem>>, vector<1x128x32xbf16>
    %147 = vector.shape_cast %146 : vector<1x128x32xbf16> to vector<128x32xbf16>
    %cst_41 = arith.constant dense<0.000000e+00> : vector<16x32xf32>
    %148 = tpu.matmul %145, %147, %cst_41 {dimension_numbers = #tpu.dot_dimension_numbers<[1], [0], [0], [1], [0, 0, 1, 1], [], []>} : vector<16x128xbf16>, vector<128x32xbf16>, vector<16x32xf32> -> vector<16x32xf32>
    %c0_42 = arith.constant 0 : index
    %c0_43 = arith.constant 0 : index
    %c0_44 = arith.constant 0 : index
    %149 = vector.load %arg12[%c0_42, %c0_43, %c0_44] : memref<1x1x32xf32, #tpu.memory_space<vmem>>, vector<1x1x32xf32>
    %150 = vector.shape_cast %149 : vector<1x1x32xf32> to vector<1x32xf32>
    %151 = vector.broadcast %150 : vector<1x32xf32> to vector<16x32xf32>
    %152 = arith.addf %148, %151 : vector<16x32xf32>
    %153 = arith.addf %134, %152 : vector<16x32xf32>
    %c0_45 = arith.constant 0 : index
    %c0_46 = arith.constant 0 : index
    %c0_47 = arith.constant 0 : index
    %154 = vector.load %arg13[%c0_45, %c0_46, %c0_47] : memref<1x1x32xf32, #tpu.memory_space<vmem>>, vector<1x1x32xf32>
    %155 = vector.shape_cast %154 : vector<1x1x32xf32> to vector<1x32xf32>
    %c0_48 = arith.constant 0 : index
    %c0_49 = arith.constant 0 : index
    %c0_50 = arith.constant 0 : index
    %156 = vector.load %arg14[%c0_48, %c0_49, %c0_50] : memref<1x1x32xf32, #tpu.memory_space<vmem>>, vector<1x1x32xf32>
    %157 = vector.shape_cast %156 : vector<1x1x32xf32> to vector<1x32xf32>
    %cst_51 = arith.constant dense<0.000000e+00> : vector<16xf32>
    %158 = vector.multi_reduction <add>, %153, %cst_51 [1] : vector<16x32xf32> to vector<16xf32>
    %159 = vector.shape_cast %158 : vector<16xf32> to vector<16x1xf32>
    %cst_52 = arith.constant 3.200000e+01 : f32
    %160 = vector.broadcast %cst_52 : f32 to vector<16x1xf32>
    %161 = arith.divf %159, %160 : vector<16x1xf32>
    %162 = vector.broadcast %161 : vector<16x1xf32> to vector<16x32xf32>
    %163 = arith.subf %153, %162 : vector<16x32xf32>
    %164 = arith.mulf %163, %163 : vector<16x32xf32>
    %cst_53 = arith.constant dense<0.000000e+00> : vector<16xf32>
    %165 = vector.multi_reduction <add>, %164, %cst_53 [1] : vector<16x32xf32> to vector<16xf32>
    %166 = vector.shape_cast %165 : vector<16xf32> to vector<16x1xf32>
    %cst_54 = arith.constant 3.200000e+01 : f32
    %167 = vector.broadcast %cst_54 : f32 to vector<16x1xf32>
    %168 = arith.divf %166, %167 : vector<16x1xf32>
    %169 = vector.broadcast %161 : vector<16x1xf32> to vector<16x32xf32>
    %170 = arith.subf %153, %169 : vector<16x32xf32>
    %cst_55 = arith.constant 9.99999974E-6 : f32
    %171 = vector.broadcast %cst_55 : f32 to vector<16x1xf32>
    %172 = arith.addf %168, %171 : vector<16x1xf32>
    %173 = math.rsqrt %172 : vector<16x1xf32>
    %174 = vector.broadcast %173 : vector<16x1xf32> to vector<16x32xf32>
    %175 = arith.mulf %170, %174 : vector<16x32xf32>
    %176 = vector.broadcast %155 : vector<1x32xf32> to vector<16x32xf32>
    %177 = arith.mulf %175, %176 : vector<16x32xf32>
    %178 = vector.broadcast %157 : vector<1x32xf32> to vector<16x32xf32>
    %179 = arith.addf %177, %178 : vector<16x32xf32>
    %c0_56 = arith.constant 0 : index
    %c0_57 = arith.constant 0 : index
    %180 = vector.load %arg16[%c0_56, %c0_57] : memref<16x32xf32, #tpu.memory_space<vmem>>, vector<16x32xf32>
    tpu.vector_store %arg16[%c0_56, %c0_57], %179 {strides = array<i32>} : memref<16x32xf32, #tpu.memory_space<vmem>>, vector<16x32xf32>,
    %c1_i32 = arith.constant 1 : i32
    %181 = arith.cmpi eq, %arg1, %c1_i32 : i32
    %182 = arith.extui %181 : i1 to i32
    %c0_i32_58 = arith.constant 0 : i32
    %183 = arith.cmpi ne, %182, %c0_i32_58 : i32
    scf.if %183 {
      %c0_59 = arith.constant 0 : index
      %c0_60 = arith.constant 0 : index
      %184 = vector.load %arg15[%c0_59, %c0_60] : memref<16x32xf32, #tpu.memory_space<vmem>>, vector<16x32xf32>
      tpu.vector_store %arg15[%c0_59, %c0_60], %179 {strides = array<i32>} : memref<16x32xf32, #tpu.memory_space<vmem>>, vector<16x32xf32>,
    } else {
    }
    return
  }
  func.func @transform_0(%arg0: i32, %arg1: i32) -> (i32, i32) {
    %c0_i32 = arith.constant 0 : i32
    %c0_i32_0 = arith.constant 0 : i32
    return %arg0, %c0_i32 : i32, i32
  }
  func.func @transform_1(%arg0: i32, %arg1: i32) -> (i32, i32, i32) {
    %c0_i32 = arith.constant 0 : i32
    %c0_i32_0 = arith.constant 0 : i32
    %c0_i32_1 = arith.constant 0 : i32
    return %arg1, %c0_i32, %c0_i32_0 : i32, i32, i32
  }
  func.func @transform_2(%arg0: i32, %arg1: i32) -> (i32, i32, i32) {
    %c0_i32 = arith.constant 0 : i32
    %c0_i32_0 = arith.constant 0 : i32
    %c0_i32_1 = arith.constant 0 : i32
    return %arg1, %c0_i32, %c0_i32_0 : i32, i32, i32
  }
  func.func @transform_3(%arg0: i32, %arg1: i32) -> (i32, i32, i32) {
    %c0_i32 = arith.constant 0 : i32
    %c0_i32_0 = arith.constant 0 : i32
    %c0_i32_1 = arith.constant 0 : i32
    return %arg1, %c0_i32, %c0_i32_0 : i32, i32, i32
  }
  func.func @transform_4(%arg0: i32, %arg1: i32) -> (i32, i32, i32) {
    %c0_i32 = arith.constant 0 : i32
    %c0_i32_0 = arith.constant 0 : i32
    %c0_i32_1 = arith.constant 0 : i32
    return %arg1, %c0_i32, %c0_i32_0 : i32, i32, i32
  }
  func.func @transform_5(%arg0: i32, %arg1: i32) -> (i32, i32, i32) {
    %c0_i32 = arith.constant 0 : i32
    %c0_i32_0 = arith.constant 0 : i32
    %c0_i32_1 = arith.constant 0 : i32
    return %arg1, %c0_i32, %c0_i32_0 : i32, i32, i32
  }
  func.func @transform_6(%arg0: i32, %arg1: i32) -> (i32, i32, i32) {
    %c0_i32 = arith.constant 0 : i32
    %c0_i32_0 = arith.constant 0 : i32
    %c0_i32_1 = arith.constant 0 : i32
    return %arg1, %c0_i32, %c0_i32_0 : i32, i32, i32
  }
  func.func @transform_7(%arg0: i32, %arg1: i32) -> (i32, i32, i32) {
    %c0_i32 = arith.constant 0 : i32
    %c0_i32_0 = arith.constant 0 : i32
    %c0_i32_1 = arith.constant 0 : i32
    return %arg1, %c0_i32, %c0_i32_0 : i32, i32, i32
  }
  func.func @transform_8(%arg0: i32, %arg1: i32) -> (i32, i32, i32) {
    %c0_i32 = arith.constant 0 : i32
    %c0_i32_0 = arith.constant 0 : i32
    %c0_i32_1 = arith.constant 0 : i32
    return %arg1, %c0_i32, %c0_i32_0 : i32, i32, i32
  }
  func.func @transform_9(%arg0: i32, %arg1: i32) -> (i32, i32, i32) {
    %c0_i32 = arith.constant 0 : i32
    %c0_i32_0 = arith.constant 0 : i32
    %c0_i32_1 = arith.constant 0 : i32
    return %arg1, %c0_i32, %c0_i32_0 : i32, i32, i32
  }
  func.func @transform_10(%arg0: i32, %arg1: i32) -> (i32, i32, i32) {
    %c0_i32 = arith.constant 0 : i32
    %c0_i32_0 = arith.constant 0 : i32
    %c0_i32_1 = arith.constant 0 : i32
    return %arg1, %c0_i32, %c0_i32_0 : i32, i32, i32
  }
  func.func @transform_11(%arg0: i32, %arg1: i32) -> (i32, i32, i32) {
    %c0_i32 = arith.constant 0 : i32
    %c0_i32_0 = arith.constant 0 : i32
    %c0_i32_1 = arith.constant 0 : i32
    return %arg1, %c0_i32, %c0_i32_0 : i32, i32, i32
  }
  func.func @transform_12(%arg0: i32, %arg1: i32) -> (i32, i32, i32) {
    %c0_i32 = arith.constant 0 : i32
    %c0_i32_0 = arith.constant 0 : i32
    %c0_i32_1 = arith.constant 0 : i32
    return %arg1, %c0_i32, %c0_i32_0 : i32, i32, i32
  }
  func.func @transform_13(%arg0: i32, %arg1: i32) -> (i32, i32) {
    %c0_i32 = arith.constant 0 : i32
    %c0_i32_0 = arith.constant 0 : i32
    return %arg0, %c0_i32 : i32, i32
  }
}

</mosaic_0001>

<bundles_post_ra>
// kernel: tpu_custom_call.1
= control target key start
LH: loop header
LB: loop body
LE: loop exit
PB: predicated region body
PF: predicated region fallthrough
CT: control target
= control target key end

     0   :  { %s4567_s0 = inlined_call_operand.vmem [shape: f32[16,32], index: 0, kind: input, shape index: {}]   ;;  %s4568_s1 = inlined_call_operand.vmem [shape: bf16[2,32,96], index: 1, kind: input, shape index: {}]   ;;  %s4569_s2 = inlined_call_operand.vmem [shape: f32[2,1,96], index: 2, kind: input, shape index: {}]   ;;  %s4570_s3 = inlined_call_operand.vmem [shape: bf16[2,32,32], index: 3, kind: input, shape index: {}]   ;;  %s4571_s4 = inlined_call_operand.vmem [shape: f32[2,1,32], index: 4, kind: input, shape index: {}]   ;;  %s4572_s5 = inlined_call_operand.vmem [shape: f32[2,1,32], index: 5, kind: input, shape index: {}]   ;;  %s4573_s6 = inlined_call_operand.vmem [shape: f32[2,1,32], index: 6, kind: input, shape index: {}]   ;;  %s4574_s7 = inlined_call_operand.vmem [shape: bf16[2,32,128], index: 7, kind: input, shape index: {}]   ;;  %s4575_s8 = inlined_call_operand.vmem [shape: f32[2,1,128], index: 8, kind: input, shape index: {}]   ;;  %s4576_s9 = inlined_call_operand.vmem [shape: bf16[2,128,32], index: 9, kind: input, shape index: {}]   ;;  %s4577_s10 = inlined_call_operand.vmem [shape: f32[2,1,32], index: 10, kind: input, shape index: {}]   ;;  %s4578_s11 = inlined_call_operand.vmem [shape: f32[2,1,32], index: 11, kind: input, shape index: {}]   ;;  %s4579_s12 = inlined_call_operand.vmem [shape: f32[2,1,32], index: 12, kind: input, shape index: {}]   ;;  %s4580_s13 = inlined_call_operand.hbm [shape: f32[16,32], index: 13, kind: output, shape index: {}]  }
   0x1   :  { %4584 = sst [smem:[#allocation9_spill]] %s4567_s0 }
   0x2   :  { %4585 = sst [smem:[#allocation10_spill]] %s4568_s1 }
   0x3   :  { %4586 = sst [smem:[#allocation11_spill]] %s4570_s3 }
   0x4   :  { %4587 = sst [smem:[#allocation12_spill]] %s4580_s13 }
   0x5   :  { %18 = vsyncpa [#allocation4], 0  ;;  %s3887_s25 = smov 0   ;;  %s3889_s26 = smov 0  }
   0x6   :  { %s3891_s27 = smov 0  }
   0x7 LB: > { %4588 = sst [smem:[#allocation6_spill]] %s3791_s26  ;;  %s33_s29 = sadd.s32 1, %s3791_s26  ;;  %s3795_s27 = sphi %s3891_s27, %s24_s27   ;;  %s3791_s26 = sphi %s3889_s26, %s4604_s26   ;;  %s3787_s25 = sphi %s3887_s25, %s4603_s25  }
   0x8   : > { %4589 = sst [smem:[#allocation7_spill]] %s3795_s27  ;;  %p34_p0 = scmp.ge.s32.totalorder %s33_s29, 2 }
   0x9   : > { %p3143_p1 = scmp.ge.s32.totalorder %s3795_s27, 1  ;;  %p505_p2 = scmp.lt.s32.totalorder %s3795_s27, 3 }
   0xa   : > { %s4606_s29 = smov (%p34_p0, %s33_s29), 0 }
   0xb   : > { %4590 = sst [smem:[#allocation8_spill]] %s4606_s29  ;;  %p506_p3 = pnand %p3143_p1, %p505_p2 }
   0xc   : > { %p594_p4 = scmp.lt.s32.totalorder (!%p506_p3), %s3787_s25, 1  ;;  %s4591_s1 = sld [smem:[#allocation10_spill]] (!%p506_p3) }
   0xd   : > { %509 = sbr.rel (%p506_p3) target bundleno = 2650 (0xa5a), region = 72  ;;  %s4592_s3 = sld [smem:[#allocation11_spill]] (!%p506_p3) }
   0xe   : > { %p3152_p5 = scmp.ne.s32.totalorder (!%p506_p3), %s3787_s25, 0 }
  0x12   : > { %s3910_s30 = scalar_select %p594_p4, %s3787_s25, 1 }
  0x13   : > { %s4593_s28 = sld [smem:[#allocation9_spill]] (!%p3152_p5) }
  0x14   : > { %s3215_s14 = sshll.u32 %s3910_s30, 4  ;;  %s631_s0 = scalar_lea.vmem %s4577_s10, %s3910_s30 }
  0x15   : > { %s598_s20 = scalar_lea.vmem %s4591_s1, %s3215_s14  ;;  %s3923_s23 = scalar_lea.vmem %s4592_s3, %s3215_s14 }
  0x16   : > { %s3940_s19 = scalar_lea.vmem %s4574_s7, %s3215_s14  ;;  %s623_s1 = scalar_lea.vmem %s4575_s8, %s3910_s30 }
  0x17   : > { %s3218_s3 = sshll.u32 %s3910_s30, 6  ;;  %s634_s17 = scalar_lea.vmem %s4578_s11, %s3910_s30 }
  0x18   : > { %s3950_s29 = scalar_lea.vmem %s4576_s9, %s3218_s3  ;;  %s637_s27 = scalar_lea.vmem %s4579_s12, %s3910_s30 }
  0x19   : > { %643 = sbr.rel (%p3152_p5) target bundleno = 32 (0x20), region = 76 }
  0x1e   : > { %v644_v0 = vld [vmem:[%s4593_s28] sm:$0xff]  ;;  %vm646_vm0 = vcmask 261120   ;;  %v645_v1 = vld [vmem:[%s4593_s28 + $0x8] sm:$0xff] }
  0x1f   : > { %647 = vst.msk [vmem:[#allocation2] sm:$0xff] %vm646_vm0, %v644_v0  ;;  %648 = vst.msk [vmem:[#allocation2 + $0x8] sm:$0xff] %vm646_vm0, %v645_v1 }
  0x20 PF: > { %v3657_v2 = vld [vmem:[%s598_s20 + $0x8] sm:$0xff]   ;;  %v3797_v3 = vmov 0.0   ;;  %v3658_v4 = vld [vmem:[%s598_s20] sm:$0xff]   ;;  %vm3798_vm1 = vmmov 0   ;;  %vm675_vm2 = vcmask 261120   ;;  %s4594_s13 = scalar_lea.vmem %s4569_s2, %s3910_s30  ;;  %s3799_s26 = smov 116  }
  0x21   : > { %3301 = vmatprep.subr.bf16.mxu0 %v3797_v3  ;;  %3321 = vmatprep.subr.bf16.mxu1 %v3797_v3  ;;  %v3153_v9 = vld [vmem:[%s4594_s13] ss:$0 sm:$0xff]  ;;  %s3800_s15 = smov 124   ;;  %s3801_s14 = smov 112   ;;  %vm783_vm3 = vcmask 31744   ;;  %vm1763_vm4 = vcmask 1043456  }
  0x22   : > { %3302 = vmatpush3.bf16.msra.mxu0 %v3657_v2  ;;  %3305 = vmatprep.mubr.msk.bf16.mxu0 %vm3798_vm1, %v3797_v3  ;;  %s3802_s18 = smov 120   ;;  %s3803_s21 = smov 104   ;;  %vm1565_vm5 = vcmask 64512   ;;  %vm2587_vm6 = vcmask 97280   ;;  %vm2590_vm7 = vcmask 130048   ;;  %vm2593_vm8 = vcmask 162816  }
  0x23   : > { %3303 = vmatprep.subr.bf16.mxu0 %v3797_v3  ;;  %3323 = vmatprep.mubr.msk.bf16.mxu1 %vm3798_vm1, %v3797_v3  ;;  %s3804_s22 = smov 108   ;;  %s3805_s3 = smov 100   ;;  %vm2596_vm9 = vcmask 195584   ;;  %vm2599_vm10 = vcmask 228352  }
  0x24   : > { %s3806_s24 = smov 96   ;;  %s3807_s20 = smov 64  }
  0x25   : > { %s3808_s16 = smov 4   ;;  %s3809_s13 = smov 8  }
  0x26   : > { %v649_v5 = vld [vmem:[#allocation2] sm:$0xff]  ;;  %v650_v6 = vld [vmem:[#allocation2 + $0x8] sm:$0xff]  ;;  %3304 = vmatpush3.bf16.msra.mxu0 %v3658_v4  ;;  %p3210_p6 = scmp.ne.s32.totalorder %s3787_s25, 1 }
  0x27   : > { %v651_v7 = vpack.c.bf16 %v650_v6, %v649_v5  ;;  %3309 = vmatprep.subr.bf16.mxu0 %v3797_v3 }
  0x29   : > { %3306 = vmatmul.mubr.msk.bf16.vlgmr.msra.gmra.mxu0 %vm675_vm2, %v651_v7 }
  0x2a   : > { %3311 = vmatprep.mubr.msk.bf16.mxu0 %vm3798_vm1, %v3797_v3 }
  0xe9   : > { %v713_v8 = vpop.f32.mrf.mxu0 }
  0xea   : > { %v714_v12 = vadd.f32 %v3153_v9, %v713_v8 }
  0xeb   : > { %v3307_v10 = vpop.f32.mrf.mxu0 }
  0xec   : > { %v3987_v16 = vpack.c.bf16 %v714_v12, %v714_v12 }
  0xed   : > { %v716_v11 = vpop.f32.mrf.mxu0 }
  0xee   : > { %v717_v13 = vadd.f32 %v3153_v9, %v716_v11 }
  0xef   : > { %v3308_v14 = vpop.f32.mrf.mxu0 }
  0xf0   : > { %v3597_v15 = vpack.i.bf16 %v717_v13, %v714_v12  ;;  %v3991_v17 = vpack.c.bf16 %v717_v13, %v717_v13 }
  0xf2   : > { %3598 = vrot.lane.b32.xlu1 %v3597_v15, %s3799_s26  ;;  %3588 = vrot.lane.b32.xlu0 %v3597_v15, %s3800_s15  ;;  %s3810_s26 = smov 12   ;;  %s3811_s15 = smov 16  }
  0xf6   : > { %3603 = vrot.lane.b32.xlu1 %v3597_v15, %s3801_s14  ;;  %3593 = vrot.lane.b32.xlu0 %v3597_v15, %s3802_s18  ;;  %s3812_s14 = smov 20   ;;  %s3813_s18 = smov 24  }
  0xfa   : > { %3613 = vrot.lane.b32.xlu1 %v3597_v15, %s3803_s21  ;;  %3608 = vrot.lane.b32.xlu0 %v3597_v15, %s3804_s22  ;;  %s3814_s21 = smov 28  }
  0xfe   : > { %3618 = vrot.lane.b32.xlu1 %v3597_v15, %s3805_s3  ;;  %781 = vrot.lane.b32.xlu0 %v3987_v16, %s3806_s24  ;;  %s4595_s3 = scalar_lea.vmem %s4571_s4, %s3910_s30 }
 0x102   : > { %831 = vrot.lane.b32.xlu0 %v3991_v17, %s3806_s24 }
 0x164   : > { %v3589_v18 = vpop.permute.xlu0 %3588  ;;  %v3599_v21 = vpop.permute.xlu1 %3598 }
 0x165   : > { %v3591_v19 = vunpack.i.h.bf16 %v3589_v18  ;;  %v3590_v20 = vunpack.i.l.bf16 %v3589_v18  ;;  %v3601_v27 = vunpack.i.h.bf16 %v3599_v21  ;;  %v3600_v28 = vunpack.i.l.bf16 %v3599_v21 }
 0x167   : > { %v3995_v22 = vpack.c.bf16 %v3591_v19, %v3591_v19  ;;  %v3997_v23 = vpack.c.bf16 %v3590_v20, %v3590_v20  ;;  %v4011_v33 = vpack.c.bf16 %v3601_v27, %v3601_v27  ;;  %v4013_v34 = vpack.c.bf16 %v3600_v28, %v3600_v28 }
 0x168   : > { %v3594_v24 = vpop.permute.xlu0 %3593  ;;  %v3604_v31 = vpop.permute.xlu1 %3603 }
 0x169   : > { %v3596_v25 = vunpack.i.h.bf16 %v3594_v24  ;;  %v3595_v26 = vunpack.i.l.bf16 %v3594_v24  ;;  %880 = vrot.lane.b32.xlu1 %v3997_v23, %s3806_s24  ;;  %929 = vrot.lane.b32.xlu0 %v3995_v22, %s3806_s24  ;;  %v3606_v35 = vunpack.i.h.bf16 %v3604_v31  ;;  %v3605_v36 = vunpack.i.l.bf16 %v3604_v31 }
 0x16b   : > { %v4003_v29 = vpack.c.bf16 %v3596_v25, %v3596_v25  ;;  %v4005_v30 = vpack.c.bf16 %v3595_v26, %v3595_v26  ;;  %v4020_v40 = vpack.c.bf16 %v3606_v35, %v3606_v35  ;;  %v4022_v41 = vpack.c.bf16 %v3605_v36, %v3605_v36 }
 0x16c   : > { %v3609_v32 = vpop.permute.xlu0 %3608  ;;  %v3614_v39 = vpop.permute.xlu1 %3613 }
 0x16d   : > { %978 = vrot.lane.b32.xlu1 %v4005_v30, %s3806_s24  ;;  %1027 = vrot.lane.b32.xlu0 %v4003_v29, %s3806_s24  ;;  %v3610_v42 = vunpack.i.l.bf16 %v3609_v32  ;;  %v3611_v43 = vunpack.i.h.bf16 %v3609_v32  ;;  %v3615_v45 = vunpack.i.l.bf16 %v3614_v39  ;;  %v3616_v47 = vunpack.i.h.bf16 %v3614_v39 }
 0x16f   : > { %v4029_v46 = vpack.c.bf16 %v3610_v42, %v3610_v42  ;;  %v4031_v48 = vpack.c.bf16 %v3611_v43, %v3611_v43  ;;  %v4040_v51 = vpack.c.bf16 %v3615_v45, %v3615_v45  ;;  %v4045_v53 = vpack.c.bf16 %v3616_v47, %v3616_v47 }
 0x170   : > { %v782_v37 = vpop.permute.xlu0 %781  ;;  %v3619_v49 = vpop.permute.xlu1 %3618 }
 0x171   : > { %v788_v38 = vsel %vm783_vm3, %v782_v37, 0  ;;  %1076 = vrot.lane.b32.xlu1 %v4013_v34, %s3806_s24  ;;  %1125 = vrot.lane.b32.xlu0 %v4011_v33, %s3806_s24  ;;  %v3620_v52 = vunpack.i.l.bf16 %v3619_v49  ;;  %v3621_v54 = vunpack.i.h.bf16 %v3619_v49 }
 0x172   : > { %3310 = vmatpush3.bf16.xpose.msra.mxu0 %v788_v38 }
 0x173   : > { %3315 = vmatprep.subr.bf16.mxu0 %v3797_v3  ;;  %v4051_v55 = vpack.c.bf16 %v3620_v52, %v3620_v52  ;;  %v4053_v56 = vpack.c.bf16 %v3621_v54, %v3621_v54 }
 0x174   : > { %v832_v44 = vpop.permute.xlu0 %831 }
 0x175   : > { %1174 = vrot.lane.b32.xlu1 %v4022_v41, %s3806_s24  ;;  %1223 = vrot.lane.b32.xlu0 %v4020_v40, %s3806_s24  ;;  %v837_v50 = vsel %vm783_vm3, %v832_v44, 0 }
 0x179   : > { %3312 = vmatmul.mubr.msk.bf16.vlgmr.msra.gmra.mxu0 %vm783_vm3, %v3987_v16  ;;  %1272 = vrot.lane.b32.xlu1 %v4029_v46, %s3806_s24 }
 0x17a   : > { %1321 = vrot.lane.b32.xlu0 %v4031_v48, %s3806_s24  ;;  %3316 = vmatpush3.bf16.xpose.msra.mxu0 %v837_v50 }
 0x17b   : > { %3317 = vmatprep.mubr.msk.bf16.mxu0 %vm3798_vm1, %v3797_v3  ;;  %3327 = vmatprep.subr.bf16.mxu0 %v3797_v3 }
 0x17d   : > { %1370 = vrot.lane.b32.xlu1 %v4040_v51, %s3806_s24 }
 0x17e   : > { %1419 = vrot.lane.b32.xlu0 %v4045_v53, %s3806_s24 }
 0x181   : > { %1468 = vrot.lane.b32.xlu1 %v4051_v55, %s3806_s24  ;;  %3318 = vmatmul.mubr.msk.bf16.vlgmr.msra.gmra.mxu0 %vm783_vm3, %v3991_v17 }
 0x182   : > { %1517 = vrot.lane.b32.xlu0 %v4053_v56, %s3806_s24  ;;  %3329 = vmatprep.mubr.msk.bf16.mxu0 %vm3798_vm1, %v3797_v3 }
 0x185   : > { %1807 = vrot.lane.b32.xlu1 %v3991_v17, %s3807_s20 }
 0x186   : > { %1758 = vrot.lane.b32.xlu0 %v3987_v16, %s3807_s20 }
 0x189   : > { %1903 = vrot.lane.b32.xlu1 %v3995_v22, %s3807_s20 }
 0x18a   : > { %1855 = vrot.lane.b32.xlu0 %v3997_v23, %s3807_s20 }
 0x18d   : > { %1999 = vrot.lane.b32.xlu1 %v4003_v29, %s3807_s20 }
 0x18e   : > { %1951 = vrot.lane.b32.xlu0 %v4005_v30, %s3807_s20 }
 0x191   : > { %2095 = vrot.lane.b32.xlu1 %v4011_v33, %s3807_s20 }
 0x192   : > { %2047 = vrot.lane.b32.xlu0 %v4013_v34, %s3807_s20 }
 0x195   : > { %2191 = vrot.lane.b32.xlu1 %v4020_v40, %s3807_s20 }
 0x196   : > { %2143 = vrot.lane.b32.xlu0 %v4022_v41, %s3807_s20 }
 0x1db   : > { %v881_v57 = vpop.permute.xlu1 %880  ;;  %v930_v58 = vpop.permute.xlu0 %929 }
 0x1dc   : > { %v935_v59 = vsel %vm783_vm3, %v930_v58, 0  ;;  %v886_v60 = vsel %vm783_vm3, %v881_v57, 0 }
 0x1dd   : > { %3322 = vmatpush3.bf16.xpose.msra.mxu1 %v886_v60  ;;  %3328 = vmatpush3.bf16.xpose.msra.mxu0 %v935_v59 }
 0x1de   : > { %3333 = vmatprep.subr.bf16.mxu1 %v3797_v3  ;;  %3339 = vmatprep.subr.bf16.mxu0 %v3797_v3 }
 0x1df   : > { %v979_v61 = vpop.permute.xlu1 %978  ;;  %v1028_v62 = vpop.permute.xlu0 %1027 }
 0x1e0   : > { %v984_v63 = vsel %vm783_vm3, %v979_v61, 0  ;;  %v1033_v0 = vsel %vm783_vm3, %v1028_v62, 0 }
 0x1e3   : > { %v1077_v1 = vpop.permute.xlu1 %1076  ;;  %v1126_v2 = vpop.permute.xlu0 %1125 }
 0x1e4   : > { %3324 = vmatmul.mubr.msk.bf16.vlgmr.msra.gmra.mxu1 %vm783_vm3, %v3997_v23  ;;  %3330 = vmatmul.mubr.msk.bf16.vlgmr.msra.gmra.mxu0 %vm783_vm3, %v3995_v22  ;;  %v1082_v4 = vsel %vm783_vm3, %v1077_v1, 0  ;;  %v1131_v5 = vsel %vm783_vm3, %v1126_v2, 0 }
 0x1e5   : > { %3334 = vmatpush3.bf16.xpose.msra.mxu1 %v984_v63  ;;  %3340 = vmatpush3.bf16.xpose.msra.mxu0 %v1033_v0 }
 0x1e6   : > { %3335 = vmatprep.mubr.msk.bf16.mxu1 %vm3798_vm1, %v3797_v3  ;;  %3341 = vmatprep.mubr.msk.bf16.mxu0 %vm3798_vm1, %v3797_v3 }
 0x1e7   : > { %3345 = vmatprep.subr.bf16.mxu1 %v3797_v3  ;;  %3351 = vmatprep.subr.bf16.mxu0 %v3797_v3  ;;  %v1175_v6 = vpop.permute.xlu1 %1174  ;;  %v1224_v7 = vpop.permute.xlu0 %1223 }
 0x1e8   : > { %v1180_v8 = vsel %vm783_vm3, %v1175_v6, 0  ;;  %v1229_v9 = vsel %vm783_vm3, %v1224_v7, 0 }
 0x1eb   : > { %v1273_v10 = vpop.permute.xlu1 %1272 }
 0x1ec   : > { %3336 = vmatmul.mubr.msk.bf16.vlgmr.msra.gmra.mxu1 %vm783_vm3, %v4005_v30  ;;  %3342 = vmatmul.mubr.msk.bf16.vlgmr.msra.gmra.mxu0 %vm783_vm3, %v4003_v29  ;;  %v1322_v11 = vpop.permute.xlu0 %1321  ;;  %v1278_v12 = vsel %vm783_vm3, %v1273_v10, 0 }
 0x1ed   : > { %3346 = vmatpush3.bf16.xpose.msra.mxu1 %v1082_v4  ;;  %3352 = vmatpush3.bf16.xpose.msra.mxu0 %v1131_v5  ;;  %v1327_v13 = vsel %vm783_vm3, %v1322_v11, 0 }
 0x1ee   : > { %3347 = vmatprep.mubr.msk.bf16.mxu1 %vm3798_vm1, %v3797_v3  ;;  %3353 = vmatprep.mubr.msk.bf16.mxu0 %vm3798_vm1, %v3797_v3 }
 0x1ef   : > { %3357 = vmatprep.subr.bf16.mxu1 %v3797_v3  ;;  %3363 = vmatprep.subr.bf16.mxu0 %v3797_v3  ;;  %v1371_v14 = vpop.permute.xlu1 %1370 }
 0x1f0   : > { %v1420_v15 = vpop.permute.xlu0 %1419  ;;  %v1376_v16 = vsel %vm783_vm3, %v1371_v14, 0 }
 0x1f1   : > { %v1425_v17 = vsel %vm783_vm3, %v1420_v15, 0 }
 0x1f3   : > { %v1469_v18 = vpop.permute.xlu1 %1468 }
 0x1f4   : > { %3348 = vmatmul.mubr.msk.bf16.vlgmr.msra.gmra.mxu1 %vm783_vm3, %v4013_v34  ;;  %3354 = vmatmul.mubr.msk.bf16.vlgmr.msra.gmra.mxu0 %vm783_vm3, %v4011_v33  ;;  %v1518_v19 = vpop.permute.xlu0 %1517  ;;  %v1474_v20 = vsel %vm783_vm3, %v1469_v18, 0 }
 0x1f5   : > { %3358 = vmatpush3.bf16.xpose.msra.mxu1 %v1180_v8  ;;  %3364 = vmatpush3.bf16.xpose.msra.mxu0 %v1229_v9  ;;  %v1523_v21 = vsel %vm783_vm3, %v1518_v19, 0 }
 0x1f6   : > { %3359 = vmatprep.mubr.msk.bf16.mxu1 %vm3798_vm1, %v3797_v3  ;;  %3365 = vmatprep.mubr.msk.bf16.mxu0 %vm3798_vm1, %v3797_v3 }
 0x1f7   : > { %3369 = vmatprep.subr.bf16.mxu1 %v3797_v3  ;;  %3375 = vmatprep.subr.bf16.mxu0 %v3797_v3  ;;  %v1808_v22 = vpop.permute.xlu1 %1807 }
 0x1f8   : > { %v1759_v23 = vpop.permute.xlu0 %1758  ;;  %v1813_v24 = vsel %vm1763_vm4, %v1808_v22, 0 }
 0x1f9   : > { %v1765_v25 = vsel %vm1763_vm4, %v1759_v23, 0 }
 0x1fb   : > { %v4191_v50 = vpop.permute.xlu1 %1903 }
 0x1fc   : > { %3360 = vmatmul.mubr.msk.bf16.vlgmr.msra.gmra.mxu1 %vm783_vm3, %v4022_v41  ;;  %3366 = vmatmul.mubr.msk.bf16.vlgmr.msra.gmra.mxu0 %vm783_vm3, %v4020_v40  ;;  %v4203_v2 = vpop.permute.xlu0 %1855 }
 0x1fd   : > { %3370 = vmatpush3.bf16.xpose.msra.mxu1 %v1278_v12  ;;  %3376 = vmatpush3.bf16.xpose.msra.mxu0 %v1327_v13 }
 0x1fe   : > { %3371 = vmatprep.mubr.msk.bf16.mxu1 %vm3798_vm1, %v3797_v3  ;;  %3377 = vmatprep.mubr.msk.bf16.mxu0 %vm3798_vm1, %v3797_v3 }
 0x1ff   : > { %3381 = vmatprep.subr.bf16.mxu1 %v3797_v3  ;;  %3387 = vmatprep.subr.bf16.mxu0 %v3797_v3  ;;  %v4197_v63 = vpop.permute.xlu1 %1999 }
 0x200   : > { %v4211_v13 = vpop.permute.xlu0 %1951 }
 0x203   : > { %v4209_v10 = vpop.permute.xlu1 %2095 }
 0x204   : > { %3372 = vmatmul.mubr.msk.bf16.vlgmr.msra.gmra.mxu1 %vm783_vm3, %v4029_v46  ;;  %3378 = vmatmul.mubr.msk.bf16.vlgmr.msra.gmra.mxu0 %vm783_vm3, %v4031_v48  ;;  %v4223_v23 = vpop.permute.xlu0 %2047 }
 0x205   : > { %3382 = vmatpush3.bf16.xpose.msra.mxu1 %v1376_v16  ;;  %3388 = vmatpush3.bf16.xpose.msra.mxu0 %v1425_v17 }
 0x206   : > { %3383 = vmatprep.mubr.msk.bf16.mxu1 %vm3798_vm1, %v3797_v3  ;;  %3389 = vmatprep.mubr.msk.bf16.mxu0 %vm3798_vm1, %v3797_v3 }
 0x207   : > { %3393 = vmatprep.subr.bf16.mxu1 %v3797_v3  ;;  %3399 = vmatprep.subr.bf16.mxu0 %v3797_v3 }
 0x20c   : > { %3384 = vmatmul.mubr.msk.bf16.vlgmr.msra.gmra.mxu1 %vm783_vm3, %v4040_v51  ;;  %3390 = vmatmul.mubr.msk.bf16.vlgmr.msra.gmra.mxu0 %vm783_vm3, %v4045_v53 }
 0x20d   : > { %3394 = vmatpush3.bf16.xpose.msra.mxu1 %v1474_v20  ;;  %3400 = vmatpush3.bf16.xpose.msra.mxu0 %v1523_v21  ;;  %v4221_v20 = vpop.permute.xlu1 %2191 }
 0x20e   : > { %3395 = vmatprep.mubr.msk.bf16.mxu1 %vm3798_vm1, %v3797_v3  ;;  %3401 = vmatprep.mubr.msk.bf16.mxu0 %vm3798_vm1, %v3797_v3 }
 0x20f   : > { %3405 = vmatprep.subr.bf16.mxu1 %v3797_v3  ;;  %3411 = vmatprep.subr.bf16.mxu0 %v3797_v3 }
 0x214   : > { %3396 = vmatmul.mubr.msk.bf16.vlgmr.msra.gmra.mxu1 %vm783_vm3, %v4051_v55  ;;  %3402 = vmatmul.mubr.msk.bf16.vlgmr.msra.gmra.mxu0 %vm783_vm3, %v4053_v56 }
 0x215   : > { %3406 = vmatpush3.bf16.msra.mxu1 %v1765_v25  ;;  %3412 = vmatpush3.bf16.msra.mxu0 %v1813_v24 }
 0x216   : > { %3407 = vmatprep.mubr.msk.bf16.mxu1 %vm3798_vm1, %v3797_v3  ;;  %3417 = vmatprep.subr.bf16.mxu1 %v3797_v3 }
 0x217   : > { %3413 = vmatprep.mubr.msk.bf16.mxu0 %vm3798_vm1, %v3797_v3  ;;  %3423 = vmatprep.subr.bf16.mxu0 %v3797_v3 }
 0x239   : > { %v4171_v26 = vpop.f32.mrf.mxu0 }
 0x23a   : > { %v1566_v27 = vsel %vm1565_vm5, %v4171_v26, -inf }
 0x23b   : > { %1567 = vmax.xlane.f32.xlu1 %v1566_v27  ;;  %v3313_v28 = vpop.f32.mrf.mxu0 }
 0x23d   : > { %v827_v29 = vpop.f32.mrf.mxu0 }
 0x23f   : > { %v3314_v30 = vpop.f32.mrf.mxu0 }
 0x241   : > { %v4175_v31 = vpop.f32.mrf.mxu0 }
 0x242   : > { %v1569_v32 = vsel %vm1565_vm5, %v4175_v31, -inf }
 0x243   : > { %1570 = vmax.xlane.f32.xlu0 %v1569_v32  ;;  %v3319_v33 = vpop.f32.mrf.mxu0 }
 0x245   : > { %v876_v34 = vpop.f32.mrf.mxu0 }
 0x247   : > { %v3320_v35 = vpop.f32.mrf.mxu0 }
 0x2a4   : > { %v4179_v36 = vpop.f32.mrf.mxu1  ;;  %v4181_v37 = vpop.f32.mrf.mxu0 }
 0x2a5   : > { %v1572_v38 = vsel %vm1565_vm5, %v4179_v36, -inf  ;;  %v1575_v39 = vsel %vm1565_vm5, %v4181_v37, -inf }
 0x2a6   : > { %v3325_v40 = vpop.f32.mrf.mxu1  ;;  %1573 = vmax.xlane.f32.xlu0 %v1572_v38  ;;  %1576 = vmax.xlane.f32.xlu1 %v1575_v39  ;;  %v3331_v41 = vpop.f32.mrf.mxu0 }
 0x2a7   : > { %v4234_v39 = vpop.permute.xlu0 %2143 }
 0x2a8   : > { %v925_v42 = vpop.f32.mrf.mxu1  ;;  %v974_v43 = vpop.f32.mrf.mxu0 }
 0x2aa   : > { %v3326_v44 = vpop.f32.mrf.mxu1  ;;  %v3332_v45 = vpop.f32.mrf.mxu0 }
 0x2ac   : > { %v4187_v47 = vpop.f32.mrf.mxu1  ;;  %v4189_v49 = vpop.f32.mrf.mxu0 }
 0x2ad   : > { %v1578_v52 = vsel %vm1565_vm5, %v4187_v47, -inf  ;;  %v1581_v54 = vsel %vm1565_vm5, %v4189_v49, -inf }
 0x2ae   : > { %v3337_v57 = vpop.f32.mrf.mxu1  ;;  %1579 = vmax.xlane.f32.xlu0 %v1578_v52  ;;  %1582 = vmax.xlane.f32.xlu1 %v1581_v54  ;;  %v3343_v58 = vpop.f32.mrf.mxu0 }
 0x2b0   : > { %v1023_v59 = vpop.f32.mrf.mxu1  ;;  %v1072_v60 = vpop.f32.mrf.mxu0 }
 0x2b2   : > { %v3338_v61 = vpop.f32.mrf.mxu1  ;;  %v3344_v62 = vpop.f32.mrf.mxu0 }
 0x2b4   : > { %v4199_v0 = vpop.f32.mrf.mxu1  ;;  %v4201_v1 = vpop.f32.mrf.mxu0 }
 0x2b5   : > { %v1584_v4 = vsel %vm1565_vm5, %v4199_v0, -inf  ;;  %v1587_v5 = vsel %vm1565_vm5, %v4201_v1, -inf }
 0x2b6   : > { %v3349_v6 = vpop.f32.mrf.mxu1  ;;  %1585 = vmax.xlane.f32.xlu0 %v1584_v4  ;;  %1588 = vmax.xlane.f32.xlu1 %v1587_v5  ;;  %v3355_v7 = vpop.f32.mrf.mxu0 }
 0x2b8   : > { %v1121_v8 = vpop.f32.mrf.mxu1  ;;  %v1170_v9 = vpop.f32.mrf.mxu0 }
 0x2ba   : > { %v3350_v11 = vpop.f32.mrf.mxu1  ;;  %v3356_v12 = vpop.f32.mrf.mxu0 }
 0x2bc   : > { %v4213_v14 = vpop.f32.mrf.mxu1  ;;  %v4215_v15 = vpop.f32.mrf.mxu0 }
 0x2bd   : > { %v1590_v16 = vsel %vm1565_vm5, %v4213_v14, -inf  ;;  %v1593_v17 = vsel %vm1565_vm5, %v4215_v15, -inf }
 0x2be   : > { %v3361_v18 = vpop.f32.mrf.mxu1  ;;  %1591 = vmax.xlane.f32.xlu0 %v1590_v16  ;;  %1594 = vmax.xlane.f32.xlu1 %v1593_v17  ;;  %v3367_v19 = vpop.f32.mrf.mxu0 }
 0x2c0   : > { %v1219_v21 = vpop.f32.mrf.mxu1  ;;  %v1268_v22 = vpop.f32.mrf.mxu0 }
 0x2c2   : > { %v3362_v24 = vpop.f32.mrf.mxu1  ;;  %v3368_v25 = vpop.f32.mrf.mxu0 }
 0x2c4   : > { %v4225_v27 = vpop.f32.mrf.mxu1  ;;  %v1568_v28 = vpop.xlane.xlu1 %1567 }
 0x2c5   : > { %v1614_v29 = vsub.f32 %v4171_v26, %v1568_v28  ;;  %v4228_v30 = vpop.f32.mrf.mxu0  ;;  %v1596_v32 = vsel %vm1565_vm5, %v4225_v27, -inf }
 0x2c6   : > { %v3373_v33 = vpop.f32.mrf.mxu1  ;;  %1597 = vmax.xlane.f32.xlu0 %v1596_v32  ;;  %v1599_v34 = vsel %vm1565_vm5, %v4228_v30, -inf }
 0x2c7   : > { %v1630_v35 = vmul.f32 1.442695, %v1614_v29  ;;  %1600 = vmax.xlane.f32.xlu1 %v1599_v34  ;;  %v3379_v38 = vpop.f32.mrf.mxu0 }
 0x2c8   : > { %v1317_v40 = vpop.f32.mrf.mxu1 }
 0x2c9   : > { %3671 = vpow2.f32 %v1630_v35  ;;  %v1366_v41 = vpop.f32.mrf.mxu0 }
 0x2ca   : > { %v3374_v42 = vpop.f32.mrf.mxu1 }
 0x2cb   : > { %v3380_v26 = vpop.f32.mrf.mxu0 }
 0x2cc   : > { %v4236_v43 = vpop.f32.mrf.mxu1  ;;  %v1571_v44 = vpop.xlane.xlu0 %1570 }
 0x2cd   : > { %v1615_v45 = vsub.f32 %v4175_v31, %v1571_v44  ;;  %v4239_v52 = vpop.f32.mrf.mxu0  ;;  %v1602_v54 = vsel %vm1565_vm5, %v4236_v43, -inf }
 0x2ce   : > { %v3385_v57 = vpop.f32.mrf.mxu1  ;;  %1603 = vmax.xlane.f32.xlu0 %v1602_v54  ;;  %v1605_v58 = vsel %vm1565_vm5, %v4239_v52, -inf }
 0x2cf   : > { %v1632_v59 = vmul.f32 1.442695, %v1615_v45  ;;  %1606 = vmax.xlane.f32.xlu1 %v1605_v58  ;;  %v3391_v60 = vpop.f32.mrf.mxu0 }
 0x2d0   : > { %v1415_v61 = vpop.f32.mrf.mxu1 }
 0x2d1   : > { %3673 = vpow2.f32 %v1632_v59  ;;  %v1464_v62 = vpop.f32.mrf.mxu0 }
 0x2d2   : > { %v3386_v4 = vpop.f32.mrf.mxu1 }
 0x2d3   : > { %v3392_v5 = vpop.f32.mrf.mxu0 }
 0x2d4   : > { %v4245_v6 = vpop.f32.mrf.mxu1 }
 0x2d5   : > { %v4247_v31 = vpop.f32.mrf.mxu0  ;;  %v1608_v19 = vsel %vm1565_vm5, %v4245_v6, -inf }
 0x2d6   : > { %v4249_v7 = vpop.eup %3671  ;;  %v3397_v8 = vpop.f32.mrf.mxu1  ;;  %v1611_v24 = vsel %vm1565_vm5, %v4247_v31, -inf }
 0x2d7   : > { %v3403_v9 = vpop.f32.mrf.mxu0  ;;  %v1662_v11 = vsel %vm1565_vm5, %v4249_v7, 0.0 }
 0x2d8   : > { %v1513_v12 = vpop.f32.mrf.mxu1  ;;  %1663 = vadd.xlane.f32.xlu0 %v1662_v11 }
 0x2d9   : > { %v1562_v16 = vpop.f32.mrf.mxu0 }
 0x2da   : > { %v3398_v17 = vpop.f32.mrf.mxu1 }
 0x2db   : > { %v3404_v18 = vpop.f32.mrf.mxu0 }
 0x2dc   : > { %1609 = vmax.xlane.f32.xlu0 %v1608_v19 }
 0x2de   : > { %v4255_v21 = vpop.eup %3673 }
 0x2df   : > { %v1665_v22 = vsel %vm1565_vm5, %v4255_v21, 0.0 }
 0x2e0   : > { %1666 = vadd.xlane.f32.xlu1 %v1665_v22 }
 0x2e4   : > { %1612 = vmax.xlane.f32.xlu1 %v1611_v24 }
 0x2f2   : > { %2287 = vrot.lane.b32.xlu0 %v4031_v48, %s3807_s20 }
 0x2f5   : > { %2239 = vrot.lane.b32.xlu1 %v4029_v46, %s3807_s20 }
 0x32f   : > { %v1574_v25 = vpop.xlane.xlu0 %1573  ;;  %v1577_v28 = vpop.xlane.xlu1 %1576 }
 0x330   : > { %v1616_v29 = vsub.f32 %v4179_v36, %v1574_v25  ;;  %v1617_v32 = vsub.f32 %v4181_v37, %v1577_v28 }
 0x332   : > { %v1634_v33 = vmul.f32 1.442695, %v1616_v29  ;;  %v1636_v34 = vmul.f32 1.442695, %v1617_v32 }
 0x334   : > { %3675 = vpow2.f32 %v1634_v33 }
 0x335   : > { %3677 = vpow2.f32 %v1636_v34 }
 0x337   : > { %v1580_v35 = vpop.xlane.xlu0 %1579  ;;  %v1583_v38 = vpop.xlane.xlu1 %1582 }
 0x338   : > { %v1618_v40 = vsub.f32 %v4187_v47, %v1580_v35  ;;  %v1619_v41 = vsub.f32 %v4189_v49, %v1583_v38 }
 0x33a   : > { %v1638_v48 = vmul.f32 1.442695, %v1618_v40  ;;  %v1640_v42 = vmul.f32 1.442695, %v1619_v41  ;;  %v1861_v41 = vsel %vm1763_vm4, %v4203_v2, 0 }
 0x33c   : > { %3679 = vpow2.f32 %v1638_v48 }
 0x33d   : > { %3681 = vpow2.f32 %v1640_v42 }
 0x33f   : > { %v1586_v46 = vpop.xlane.xlu0 %1585  ;;  %v1589_v26 = vpop.xlane.xlu1 %1588 }
 0x340   : > { %v1620_v36 = vsub.f32 %v4199_v0, %v1586_v46  ;;  %v1621_v37 = vsub.f32 %v4201_v1, %v1589_v26 }
 0x341   : > { %v4271_v44 = vpop.eup %3675 }
 0x342   : > { %v4273_v45 = vpop.eup %3677  ;;  %v1642_v54 = vmul.f32 1.442695, %v1620_v36  ;;  %v1644_v57 = vmul.f32 1.442695, %v1621_v37  ;;  %v1668_v47 = vsel %vm1565_vm5, %v4271_v44, 0.0  ;;  %v1909_v36 = vsel %vm1763_vm4, %v4191_v50, 0 }
 0x343   : > { %1669 = vadd.xlane.f32.xlu0 %v1668_v47  ;;  %v1671_v49 = vsel %vm1565_vm5, %v4273_v45, 0.0 }
 0x344   : > { %3683 = vpow2.f32 %v1642_v54  ;;  %1672 = vadd.xlane.f32.xlu1 %v1671_v49 }
 0x345   : > { %3685 = vpow2.f32 %v1644_v57 }
 0x347   : > { %v1592_v58 = vpop.xlane.xlu0 %1591  ;;  %v1595_v0 = vpop.xlane.xlu1 %1594 }
 0x348   : > { %v1622_v1 = vsub.f32 %v4213_v14, %v1592_v58  ;;  %v1623_v59 = vsub.f32 %v4215_v15, %v1595_v0 }
 0x349   : > { %v4281_v60 = vpop.eup %3679 }
 0x34a   : > { %v4283_v61 = vpop.eup %3681  ;;  %v1646_v62 = vmul.f32 1.442695, %v1622_v1  ;;  %v1648_v4 = vmul.f32 1.442695, %v1623_v59  ;;  %v1674_v5 = vsel %vm1565_vm5, %v4281_v60, 0.0 }
 0x34b   : > { %1675 = vadd.xlane.f32.xlu0 %v1674_v5  ;;  %v1677_v8 = vsel %vm1565_vm5, %v4283_v61, 0.0 }
 0x34c   : > { %3687 = vpow2.f32 %v1646_v62  ;;  %1678 = vadd.xlane.f32.xlu1 %v1677_v8 }
 0x34d   : > { %3689 = vpow2.f32 %v1648_v4 }
 0x34f   : > { %v1598_v19 = vpop.xlane.xlu0 %1597 }
 0x350   : > { %v1601_v9 = vpop.xlane.xlu1 %1600  ;;  %v1624_v48 = vsub.f32 %v4225_v27, %v1598_v19 }
 0x351   : > { %v4289_v14 = vpop.eup %3683  ;;  %v1625_v15 = vsub.f32 %v4228_v30, %v1601_v9 }
 0x352   : > { %v4292_v11 = vpop.eup %3685  ;;  %v1680_v12 = vsel %vm1565_vm5, %v4289_v14, 0.0 }
 0x353   : > { %v1652_v16 = vmul.f32 1.442695, %v1625_v15  ;;  %1681 = vadd.xlane.f32.xlu0 %v1680_v12  ;;  %v1683_v17 = vsel %vm1565_vm5, %v4292_v11, 0.0 }
 0x354   : > { %1684 = vadd.xlane.f32.xlu1 %v1683_v17 }
 0x355   : > { %3691 = vpow2.f32 %v1652_v16 }
 0x357   : > { %v1604_v25 = vpop.xlane.xlu0 %1603 }
 0x358   : > { %v1607_v33 = vpop.xlane.xlu1 %1606  ;;  %v1626_v46 = vsub.f32 %v4236_v43, %v1604_v25 }
 0x359   : > { %v4298_v18 = vpop.eup %3687 }
 0x35a   : > { %v4300_v22 = vpop.eup %3689  ;;  %v1686_v30 = vsel %vm1565_vm5, %v4298_v18, 0.0  ;;  %v1654_v27 = vmul.f32 1.442695, %v1626_v46  ;;  %v2197_v46 = vsel %vm1763_vm4, %v4221_v20, 0 }
 0x35b   : > { %v1689_v24 = vsel %vm1565_vm5, %v4300_v22, 0.0  ;;  %1687 = vadd.xlane.f32.xlu1 %v1686_v30 }
 0x35c   : > { %1690 = vadd.xlane.f32.xlu0 %v1689_v24 }
 0x361   : > { %v1664_v28 = vpop.xlane.xlu0 %1663 }
 0x362   : > { %v4306_v29 = vpop.eup %3691  ;;  %3693 = vrcp.f32 %v1664_v28  ;;  %v1957_v28 = vsel %vm1763_vm4, %v4211_v13, 0 }
 0x363   : > { %v1695_v32 = vsel %vm1565_vm5, %v4306_v29, 0.0 }
 0x364   : > { %1696 = vadd.xlane.f32.xlu0 %v1695_v32  ;;  %v2005_v32 = vsel %vm1763_vm4, %v4197_v63, 0 }
 0x365   : > { %v1610_v26 = vpop.xlane.xlu0 %1609 }
 0x369   : > { %v1667_v34 = vpop.xlane.xlu1 %1666  ;;  %v4357_v4 = vpop.permute.xlu0 %2287 }
 0x36a   : > { %3695 = vrcp.f32 %v1667_v34 }
 0x36c   : > { %2335 = vrot.lane.b32.xlu1 %v4040_v51, %s3807_s20 }
 0x36d   : > { %v1613_v43 = vpop.xlane.xlu1 %1612 }
 0x36e   : > { %v1629_v50 = vsub.f32 %v4247_v31, %v1613_v43 }
 0x36f   : > { %v3694_v35 = vpop.eup %3693 }
 0x370   : > { %v1726_v38 = vmul.f32 %v3694_v35, %v4249_v7  ;;  %v1650_v7 = vmul.f32 1.442695, %v1624_v48  ;;  %v1660_v57 = vmul.f32 1.442695, %v1629_v50 }
 0x371   : > { %v4359_v5 = vpop.permute.xlu1 %2239 }
 0x372   : > { %v1742_v40 = vpack.c.bf16 %v1726_v38, %v1726_v38  ;;  %3697 = vpow2.f32 %v1650_v7  ;;  %v2149_v7 = vsel %vm1763_vm4, %v4234_v39, 0 }
 0x373   : > { %3699 = vpow2.f32 %v1654_v27  ;;  %v2293_v27 = vsel %vm1763_vm4, %v4357_v4, 0 }
 0x374   : > { %3408 = vmatmul.mubr.msk.bf16.vlgmr.msra.gmra.mxu1 %vm1565_vm5, %v1742_v40  ;;  %v2053_v40 = vsel %vm1763_vm4, %v4223_v23, 0 }
 0x375   : > { %3418 = vmatpush3.bf16.msra.mxu1 %v1861_v41  ;;  %3419 = vmatprep.mubr.msk.bf16.mxu1 %vm3798_vm1, %v3797_v3  ;;  %v2101_v41 = vsel %vm1763_vm4, %v4209_v10, 0 }
 0x376   : > { %3429 = vmatprep.subr.bf16.mxu1 %v3797_v3 }
 0x377   : > { %v3696_v42 = vpop.eup %3695 }
 0x378   : > { %v1727_v51 = vmul.f32 %v3696_v42, %v4255_v21  ;;  %v1628_v21 = vsub.f32 %v4245_v6, %v1610_v26 }
 0x37a   : > { %2383 = vrot.lane.b32.xlu0 %v4045_v53, %s3807_s20  ;;  %v1743_v2 = vpack.c.bf16 %v1727_v51, %v1727_v51  ;;  %v1627_v53 = vsub.f32 %v4239_v52, %v1607_v33  ;;  %v1658_v37 = vmul.f32 1.442695, %v1628_v21 }
 0x37c   : > { %3414 = vmatmul.mubr.msk.bf16.vlgmr.msra.gmra.mxu0 %vm1565_vm5, %v1743_v2  ;;  %v1656_v54 = vmul.f32 1.442695, %v1627_v53  ;;  %3701 = vpow2.f32 %v1658_v37 }
 0x37d   : > { %3424 = vmatpush3.bf16.msra.mxu0 %v1909_v36  ;;  %3425 = vmatprep.mubr.msk.bf16.mxu0 %vm3798_vm1, %v3797_v3  ;;  %v2245_v36 = vsel %vm1763_vm4, %v4359_v5, 0 }
 0x37e   : > { %3435 = vmatprep.subr.bf16.mxu0 %v3797_v3  ;;  %3703 = vpow2.f32 %v1656_v54 }
 0x37f   : > { %v4333_v47 = vpop.eup %3697  ;;  %3705 = vpow2.f32 %v1660_v57 }
 0x380   : > { %v1692_v49 = vsel %vm1565_vm5, %v4333_v47, 0.0  ;;  %v4337_v6 = vpop.eup %3699 }
 0x381   : > { %v1698_v52 = vsel %vm1565_vm5, %v4337_v6, 0.0 }
 0x389   : > { %v4341_v58 = vpop.eup %3701 }
 0x38a   : > { %v1704_v31 = vsel %vm1565_vm5, %v4341_v58, 0.0 }
 0x38b   : > { %v4343_v0 = vpop.eup %3703 }
 0x38c   : > { %v1701_v1 = vsel %vm1565_vm5, %v4343_v0, 0.0  ;;  %v4349_v59 = vpop.eup %3705 }
 0x38d   : > { %v1707_v62 = vsel %vm1565_vm5, %v4349_v59, 0.0 }
 0x390   : > { %1693 = vadd.xlane.f32.xlu1 %v1692_v49 }
 0x394   : > { %1699 = vadd.xlane.f32.xlu1 %v1698_v52 }
 0x398   : > { %1705 = vadd.xlane.f32.xlu1 %v1704_v31 }
 0x399   : > { %1702 = vadd.xlane.f32.xlu0 %v1701_v1 }
 0x39d   : > { %1708 = vadd.xlane.f32.xlu0 %v1707_v62 }
 0x3a9   : > { %2431 = vrot.lane.b32.xlu1 %v4051_v55, %s3807_s20 }
 0x3b3   : > { %2479 = vrot.lane.b32.xlu0 %v4053_v56, %s3807_s20  ;;  %s4596_s20 = scalar_lea.vmem %s4572_s5, %s3910_s30 }
 0x3cc   : > { %v1670_v8 = vpop.xlane.xlu0 %1669 }
 0x3cd   : > { %3707 = vrcp.f32 %v1670_v8  ;;  %v1673_v9 = vpop.xlane.xlu1 %1672 }
 0x3ce   : > { %3709 = vrcp.f32 %v1673_v9 }
 0x3d4   : > { %v1676_v15 = vpop.xlane.xlu0 %1675 }
 0x3d5   : > { %3711 = vrcp.f32 %v1676_v15  ;;  %v1679_v12 = vpop.xlane.xlu1 %1678 }
 0x3d6   : > { %3713 = vrcp.f32 %v1679_v12 }
 0x3da   : > { %v3708_v16 = vpop.eup %3707 }
 0x3db   : > { %v3710_v17 = vpop.eup %3709  ;;  %v1728_v19 = vmul.f32 %v3708_v16, %v4271_v44 }
 0x3dc   : > { %v1682_v55 = vpop.xlane.xlu0 %1681  ;;  %v1729_v30 = vmul.f32 %v3710_v17, %v4273_v45 }
 0x3dd   : > { %3715 = vrcp.f32 %v1682_v55  ;;  %v1685_v56 = vpop.xlane.xlu1 %1684  ;;  %v1744_v24 = vpack.c.bf16 %v1728_v19, %v1728_v19 }
 0x3de   : > { %3717 = vrcp.f32 %v1685_v56  ;;  %v1745_v25 = vpack.c.bf16 %v1729_v30, %v1729_v30 }
 0x3df   : > { %3420 = vmatmul.mubr.msk.bf16.vlgmr.msra.gmra.mxu1 %vm1565_vm5, %v1744_v24 }
 0x3e0   : > { %3426 = vmatmul.mubr.msk.bf16.vlgmr.msra.gmra.mxu0 %vm1565_vm5, %v1745_v25  ;;  %3430 = vmatpush3.bf16.msra.mxu1 %v1957_v28 }
 0x3e1   : > { %3436 = vmatpush3.bf16.msra.mxu0 %v2005_v32  ;;  %3431 = vmatprep.mubr.msk.bf16.mxu1 %vm3798_vm1, %v3797_v3 }
 0x3e2   : > { %v3712_v44 = vpop.eup %3711  ;;  %3437 = vmatprep.mubr.msk.bf16.mxu0 %vm3798_vm1, %v3797_v3  ;;  %3441 = vmatprep.subr.bf16.mxu1 %v3797_v3 }
 0x3e3   : > { %v3714_v45 = vpop.eup %3713  ;;  %3447 = vmatprep.subr.bf16.mxu0 %v3797_v3  ;;  %v1730_v13 = vmul.f32 %v3712_v44, %v4281_v60 }
 0x3e4   : > { %v1688_v33 = vpop.xlane.xlu1 %1687  ;;  %v1731_v63 = vmul.f32 %v3714_v45, %v4283_v61 }
 0x3e5   : > { %v1691_v34 = vpop.xlane.xlu0 %1690  ;;  %3719 = vrcp.f32 %v1688_v33  ;;  %v1746_v35 = vpack.c.bf16 %v1730_v13, %v1730_v13 }
 0x3e6   : > { %3721 = vrcp.f32 %v1691_v34  ;;  %v1747_v38 = vpack.c.bf16 %v1731_v63, %v1731_v63 }
 0x3e7   : > { %3432 = vmatmul.mubr.msk.bf16.vlgmr.msra.gmra.mxu1 %vm1565_vm5, %v1746_v35 }
 0x3e8   : > { %3438 = vmatmul.mubr.msk.bf16.vlgmr.msra.gmra.mxu0 %vm1565_vm5, %v1747_v38  ;;  %3442 = vmatpush3.bf16.msra.mxu1 %v2053_v40  ;;  %v2336_v37 = vpop.permute.xlu1 %2335 }
 0x3e9   : > { %3448 = vmatpush3.bf16.msra.mxu0 %v2101_v41  ;;  %3443 = vmatprep.mubr.msk.bf16.mxu1 %vm3798_vm1, %v3797_v3  ;;  %v2341_v4 = vsel %vm1763_vm4, %v2336_v37, 0 }
 0x3ea   : > { %v3716_v60 = vpop.eup %3715  ;;  %3449 = vmatprep.mubr.msk.bf16.mxu0 %vm3798_vm1, %v3797_v3  ;;  %3453 = vmatprep.subr.bf16.mxu1 %v3797_v3 }
 0x3eb   : > { %v3718_v61 = vpop.eup %3717  ;;  %3459 = vmatprep.subr.bf16.mxu0 %v3797_v3  ;;  %v1732_v23 = vmul.f32 %v3716_v60, %v4289_v14 }
 0x3ec   : > { %v1733_v10 = vmul.f32 %v3718_v61, %v4292_v11 }
 0x3ed   : > { %v1697_v48 = vpop.xlane.xlu0 %1696  ;;  %v1748_v42 = vpack.c.bf16 %v1732_v23, %v1732_v23 }
 0x3ee   : > { %3723 = vrcp.f32 %v1697_v48  ;;  %v1749_v51 = vpack.c.bf16 %v1733_v10, %v1733_v10 }
 0x3ef   : > { %3444 = vmatmul.mubr.msk.bf16.vlgmr.msra.gmra.mxu1 %vm1565_vm5, %v1748_v42 }
 0x3f0   : > { %3450 = vmatmul.mubr.msk.bf16.vlgmr.msra.gmra.mxu0 %vm1565_vm5, %v1749_v51  ;;  %3454 = vmatpush3.bf16.msra.mxu1 %v2149_v7 }
 0x3f1   : > { %3460 = vmatpush3.bf16.msra.mxu0 %v2197_v46  ;;  %3455 = vmatprep.mubr.msk.bf16.mxu1 %vm3798_vm1, %v3797_v3  ;;  %v2384_v21 = vpop.permute.xlu0 %2383 }
 0x3f2   : > { %v3720_v14 = vpop.eup %3719  ;;  %3461 = vmatprep.mubr.msk.bf16.mxu0 %vm3798_vm1, %v3797_v3  ;;  %3465 = vmatprep.subr.bf16.mxu1 %v3797_v3  ;;  %v2389_v43 = vsel %vm1763_vm4, %v2384_v21, 0 }
 0x3f3   : > { %v3722_v11 = vpop.eup %3721  ;;  %3471 = vmatprep.subr.bf16.mxu0 %v3797_v3  ;;  %v1734_v39 = vmul.f32 %v3720_v14, %v4298_v18 }
 0x3f4   : > { %v1735_v20 = vmul.f32 %v3722_v11, %v4300_v22 }
 0x3f5   : > { %v1750_v2 = vpack.c.bf16 %v1734_v39, %v1734_v39 }
 0x3f6   : > { %v1751_v26 = vpack.c.bf16 %v1735_v20, %v1735_v20 }
 0x3f7   : > { %3456 = vmatmul.mubr.msk.bf16.vlgmr.msra.gmra.mxu1 %vm1565_vm5, %v1750_v2 }
 0x3f8   : > { %3462 = vmatmul.mubr.msk.bf16.vlgmr.msra.gmra.mxu0 %vm1565_vm5, %v1751_v26  ;;  %3466 = vmatpush3.bf16.msra.mxu1 %v2245_v36 }
 0x3f9   : > { %3472 = vmatpush3.bf16.msra.mxu0 %v2293_v27  ;;  %3473 = vmatprep.mubr.msk.bf16.mxu0 %vm3798_vm1, %v3797_v3 }
 0x3fa   : > { %3483 = vmatprep.subr.bf16.mxu0 %v3797_v3  ;;  %3467 = vmatprep.mubr.msk.bf16.mxu1 %vm3798_vm1, %v3797_v3 }
 0x3fb   : > { %v3724_v18 = vpop.eup %3723  ;;  %3477 = vmatprep.subr.bf16.mxu1 %v3797_v3 }
 0x3fc   : > { %v1737_v22 = vmul.f32 %v3724_v18, %v4306_v29 }
 0x3fe   : > { %v1753_v53 = vpack.c.bf16 %v1737_v22, %v1737_v22 }
 0x400   : > { %3474 = vmatmul.mubr.msk.bf16.vlgmr.msra.gmra.mxu0 %vm1565_vm5, %v1753_v53 }
 0x401   : > { %3484 = vmatpush3.bf16.msra.mxu0 %v2389_v43  ;;  %3485 = vmatprep.mubr.msk.bf16.mxu0 %vm3798_vm1, %v3797_v3 }
 0x402   : > { %3495 = vmatprep.subr.bf16.mxu0 %v3797_v3 }
 0x419   : > { %v1694_v54 = vpop.xlane.xlu1 %1693 }
 0x41a   : > { %3725 = vrcp.f32 %v1694_v54 }
 0x41d   : > { %v1700_v50 = vpop.xlane.xlu1 %1699 }
 0x41e   : > { %3727 = vrcp.f32 %v1700_v50 }
 0x421   : > { %v1706_v29 = vpop.xlane.xlu1 %1705 }
 0x422   : > { %v1703_v57 = vpop.xlane.xlu0 %1702 }
 0x423   : > { %3729 = vrcp.f32 %v1703_v57 }
 0x424   : > { %3731 = vrcp.f32 %v1706_v29 }
 0x425   : > { %v2432_v9 = vpop.permute.xlu1 %2431 }
 0x426   : > { %v1709_v49 = vpop.xlane.xlu0 %1708  ;;  %v2437_v55 = vsel %vm1763_vm4, %v2432_v9, 0  ;;  %v3659_v9 = vld [vmem:[%s3923_s23 + $0x8] sm:$0xff]  }
 0x427   : > { %v3726_v52 = vpop.eup %3725  ;;  %3733 = vrcp.f32 %v1709_v49 }
 0x428   : > { %v1736_v31 = vmul.f32 %v3726_v52, %v4333_v47 }
 0x42a   : > { %v1752_v1 = vpack.c.bf16 %v1736_v31, %v1736_v31  ;;  %v2480_v12 = vpop.permute.xlu0 %2479 }
 0x42b   : > { %v3728_v62 = vpop.eup %3727  ;;  %v2485_v56 = vsel %vm1763_vm4, %v2480_v12, 0 }
 0x42c   : > { %3468 = vmatmul.mubr.msk.bf16.vlgmr.msra.gmra.mxu1 %vm1565_vm5, %v1752_v1  ;;  %v1738_v5 = vmul.f32 %v3728_v62, %v4337_v6 }
 0x42d   : > { %3478 = vmatpush3.bf16.msra.mxu1 %v2341_v4  ;;  %3479 = vmatprep.mubr.msk.bf16.mxu1 %vm3798_vm1, %v3797_v3 }
 0x42e   : > { %3489 = vmatprep.subr.bf16.mxu1 %v3797_v3  ;;  %v1754_v47 = vpack.c.bf16 %v1738_v5, %v1738_v5 }
 0x430   : > { %v3730_v8 = vpop.eup %3729 }
 0x431   : > { %v1739_v15 = vmul.f32 %v3730_v8, %v4343_v0  ;;  %v3732_v16 = vpop.eup %3731 }
 0x432   : > { %v1740_v0 = vmul.f32 %v3732_v16, %v4341_v58 }
 0x433   : > { %v1755_v17 = vpack.c.bf16 %v1739_v15, %v1739_v15 }
 0x434   : > { %v3734_v19 = vpop.eup %3733  ;;  %v4432_v30 = vpop.f32.mrf.mxu1  ;;  %3480 = vmatmul.mubr.msk.bf16.vlgmr.msra.gmra.mxu1 %vm1565_vm5, %v1754_v47  ;;  %v1756_v32 = vpack.c.bf16 %v1740_v0, %v1740_v0 }
 0x435   : > { %3486 = vmatmul.mubr.msk.bf16.vlgmr.msra.gmra.mxu0 %vm1565_vm5, %v1755_v17  ;;  %3490 = vmatpush3.bf16.msra.mxu1 %v2437_v55  ;;  %v1741_v24 = vmul.f32 %v3734_v19, %v4349_v59  ;;  %v3660_v17 = vld [vmem:[%s3923_s23] sm:$0xff]  }
 0x436   : > { %3496 = vmatpush3.bf16.msra.mxu0 %v2485_v56  ;;  %v3409_v6 = vpop.f32.mrf.mxu1  ;;  %3491 = vmatprep.mubr.msk.bf16.mxu1 %vm3798_vm1, %v3797_v3 }
 0x437   : > { %3497 = vmatprep.mubr.msk.bf16.mxu0 %vm3798_vm1, %v3797_v3  ;;  %3501 = vmatprep.subr.bf16.mxu1 %v3797_v3  ;;  %v1757_v44 = vpack.c.bf16 %v1741_v24, %v1741_v24 }
 0x438   : > { %v1804_v25 = vpop.f32.mrf.mxu1  ;;  %3509 = vmatprep.subr.bf16.mxu0 %v3797_v3 }
 0x43a   : > { %v3410_v28 = vpop.f32.mrf.mxu1 }
 0x43c   : > { %3492 = vmatmul.mubr.msk.bf16.vlgmr.msra.gmra.mxu1 %vm1565_vm5, %v1756_v32  ;;  %v4446_v45 = vpop.f32.mrf.mxu0 }
 0x43d   : > { %3498 = vmatmul.mubr.msk.bf16.vlgmr.msra.gmra.mxu0 %vm1565_vm5, %v1757_v44  ;;  %3505 = vmatprep.mubr.msk.bf16.mxu1 %vm3798_vm1, %v3797_v3 }
 0x43e   : > { %3513 = vmatprep.mubr.msk.bf16.mxu0 %vm3798_vm1, %v3797_v3  ;;  %v3415_v58 = vpop.f32.mrf.mxu0  ;;  %3502 = vmatpush3.bf16.msra.mxu1 %v3659_v9  ;;  %v3743_v9 = vld [vmem:[#allocation2] sm:$0xff] }
 0x43f   : > { %3503 = vmatprep.subr.bf16.mxu1 %v3797_v3 }
 0x440   : > { %v1852_v59 = vpop.f32.mrf.mxu0 }
 0x442   : > { %v3416_v13 = vpop.f32.mrf.mxu0  ;;  %3504 = vmatpush3.bf16.msra.mxu1 %v3660_v17 }
 0x443   : > { %3517 = vmatprep.subr.bf16.mxu1 %v3797_v3 }
 0x49f   : > { %v1897_v33 = vpop.f32.mrf.mxu1 }
 0x4a0   : > { %v1945_v63 = vpop.f32.mrf.mxu0 }
 0x4a1   : > { %v3622_v34 = vpack.i.bf16 %v1945_v63, %v1897_v33  ;;  %v3421_v35 = vpop.f32.mrf.mxu1 }
 0x4a2   : > { %v3427_v38 = vpop.f32.mrf.mxu0 }
 0x4a3   : > { %3623 = vrot.lane.b32.xlu1 %v3622_v34, %s3808_s16  ;;  %v1900_v40 = vpop.f32.mrf.mxu1 }
 0x4a4   : > { %v1948_v41 = vpop.f32.mrf.mxu0 }
 0x4a5   : > { %v3422_v60 = vpop.f32.mrf.mxu1 }
 0x4a6   : > { %v3428_v61 = vpop.f32.mrf.mxu0 }
 0x4a7   : > { %v1993_v23 = vpop.f32.mrf.mxu1 }
 0x4a8   : > { %v2041_v10 = vpop.f32.mrf.mxu0 }
 0x4a9   : > { %v3627_v48 = vpack.i.bf16 %v2041_v10, %v1993_v23  ;;  %v3433_v42 = vpop.f32.mrf.mxu1 }
 0x4aa   : > { %v3439_v51 = vpop.f32.mrf.mxu0 }
 0x4ab   : > { %3628 = vrot.lane.b32.xlu0 %v3627_v48, %s3809_s13  ;;  %v1996_v7 = vpop.f32.mrf.mxu1 }
 0x4ac   : > { %v2044_v46 = vpop.f32.mrf.mxu0 }
 0x4ad   : > { %v3434_v14 = vpop.f32.mrf.mxu1 }
 0x4ae   : > { %v3440_v11 = vpop.f32.mrf.mxu0 }
 0x4af   : > { %v2089_v39 = vpop.f32.mrf.mxu1 }
 0x4b0   : > { %v2137_v20 = vpop.f32.mrf.mxu0 }
 0x4b1   : > { %v3632_v2 = vpack.i.bf16 %v2137_v20, %v2089_v39  ;;  %v3445_v26 = vpop.f32.mrf.mxu1 }
 0x4b2   : > { %v3451_v36 = vpop.f32.mrf.mxu0 }
 0x4b3   : > { %3633 = vrot.lane.b32.xlu1 %v3632_v2, %s3810_s26  ;;  %v2092_v27 = vpop.f32.mrf.mxu1 }
 0x4b4   : > { %v2140_v18 = vpop.f32.mrf.mxu0 }
 0x4b5   : > { %v3446_v22 = vpop.f32.mrf.mxu1 }
 0x4b6   : > { %v3452_v21 = vpop.f32.mrf.mxu0 }
 0x4b7   : > { %v2185_v53 = vpop.f32.mrf.mxu1 }
 0x4b8   : > { %v2233_v43 = vpop.f32.mrf.mxu0 }
 0x4b9   : > { %v3637_v37 = vpack.i.bf16 %v2233_v43, %v2185_v53  ;;  %v3457_v54 = vpop.f32.mrf.mxu1 }
 0x4ba   : > { %v3463_v50 = vpop.f32.mrf.mxu0 }
 0x4bb   : > { %3638 = vrot.lane.b32.xlu0 %v3637_v37, %s3811_s15  ;;  %v2188_v57 = vpop.f32.mrf.mxu1  ;;  %s4597_s15 = scalar_lea.vmem %s4573_s6, %s3910_s30 }
 0x4bc   : > { %v2236_v29 = vpop.f32.mrf.mxu0 }
 0x4bd   : > { %v3458_v49 = vpop.f32.mrf.mxu1 }
 0x4be   : > { %v3464_v52 = vpop.f32.mrf.mxu0 }
 0x4c0   : > { %v2329_v31 = vpop.f32.mrf.mxu0 }
 0x4c2   : > { %v3475_v1 = vpop.f32.mrf.mxu0 }
 0x4c4   : > { %v2332_v62 = vpop.f32.mrf.mxu0 }
 0x4c5   : > { %v3189_v62 = vld [vmem:[%s4595_s3] ss:$0 sm:$0xff] }
 0x4c6   : > { %v3476_v4 = vpop.f32.mrf.mxu0 }
 0x4ec   : > { %v2281_v5 = vpop.f32.mrf.mxu1 }
 0x4ed   : > { %v3642_v8 = vpack.i.bf16 %v2329_v31, %v2281_v5 }
 0x4ee   : > { %v3469_v15 = vpop.f32.mrf.mxu1 }
 0x4ef   : > { %3643 = vrot.lane.b32.xlu1 %v3642_v8, %s3812_s14 }
 0x4f0   : > { %v2284_v12 = vpop.f32.mrf.mxu1 }
 0x4f2   : > { %v3470_v47 = vpop.f32.mrf.mxu1 }
 0x4f4   : > { %v2377_v16 = vpop.f32.mrf.mxu1 }
 0x4f5   : > { %v2425_v19 = vpop.f32.mrf.mxu0 }
 0x4f6   : > { %v3647_v55 = vpack.i.bf16 %v2425_v19, %v2377_v16  ;;  %v3481_v56 = vpop.f32.mrf.mxu1  ;;  %v3744_v19 = vld [vmem:[#allocation2 + $0x8] sm:$0xff] }
 0x4f7   : > { %v3487_v6 = vpop.f32.mrf.mxu0 }
 0x4f8   : > { %3648 = vrot.lane.b32.xlu0 %v3647_v55, %s3813_s18  ;;  %v2380_v0 = vpop.f32.mrf.mxu1 }
 0x4f9   : > { %v2428_v24 = vpop.f32.mrf.mxu0 }
 0x4fa   : > { %v3482_v25 = vpop.f32.mrf.mxu1 }
 0x4fb   : > { %v3488_v28 = vpop.f32.mrf.mxu0 }
 0x4fc   : > { %v2473_v32 = vpop.f32.mrf.mxu1 }
 0x4fd   : > { %v2521_v44 = vpop.f32.mrf.mxu0 }
 0x4fe   : > { %v3652_v58 = vpack.i.bf16 %v2521_v44, %v2473_v32  ;;  %v3493_v59 = vpop.f32.mrf.mxu1 }
 0x4ff   : > { %v3499_v13 = vpop.f32.mrf.mxu0 }
 0x500   : > { %3653 = vrot.lane.b32.xlu1 %v3652_v58, %s3814_s21  ;;  %v2476_v33 = vpop.f32.mrf.mxu1 }
 0x501   : > { %v2524_v63 = vpop.f32.mrf.mxu0  ;;  %v3661_v33 = vld [vmem:[%s3940_s19 + $0x8] sm:$0xff]  }
 0x502   : > { %v3494_v34 = vpop.f32.mrf.mxu1  ;;  %3510 = vmatpush3.bf16.msra.mxu0 %v3661_v33  ;;  %v3662_v63 = vld [vmem:[%s3940_s19] sm:$0xff]  }
 0x503   : > { %v3500_v35 = vpop.f32.mrf.mxu0  ;;  %3511 = vmatprep.subr.bf16.mxu0 %v3797_v3  ;;  %v3663_v34 = vld [vmem:[%s3950_s29 + $0x38] sm:$0xff]  }
 0x504   : > { %v3664_v35 = vld [vmem:[%s3950_s29 + $0x30] sm:$0xff]  }
 0x506   : > { %3512 = vmatpush3.bf16.msra.mxu0 %v3662_v63  ;;  %v3208_v63 = vld [vmem:[%s634_s17] ss:$0 sm:$0xff] }
 0x515   : > { %v3624_v38 = vpop.permute.xlu1 %3623 }
 0x516   : > { %v3626_v61 = vunpack.i.h.bf16 %v3624_v38  ;;  %v3625_v23 = vunpack.i.l.bf16 %v3624_v38  ;;  %v3665_v38 = vld [vmem:[%s3950_s29 + $0x28] sm:$0xff]  }
 0x518   : > { %v2584_v39 = vsel %vm783_vm3, %v4446_v45, %v3626_v61  ;;  %v2583_v20 = vsel %vm783_vm3, %v4432_v30, %v3625_v23 }
 0x51d   : > { %v3629_v40 = vpop.permute.xlu0 %3628 }
 0x51e   : > { %v3631_v10 = vunpack.i.h.bf16 %v3629_v40  ;;  %v3630_v48 = vunpack.i.l.bf16 %v3629_v40  ;;  %v3666_v40 = vld [vmem:[%s3950_s29 + $0x20] sm:$0xff]  }
 0x520   : > { %v2586_v36 = vsel %vm1565_vm5, %v2584_v39, %v3631_v10  ;;  %v2585_v27 = vsel %vm1565_vm5, %v2583_v20, %v3630_v48  ;;  %v3194_v20 = vld [vmem:[%s4597_s15] ss:$0 sm:$0xff] }
 0x525   : > { %v3634_v41 = vpop.permute.xlu1 %3633 }
 0x526   : > { %v3636_v51 = vunpack.i.h.bf16 %v3634_v41  ;;  %v3635_v7 = vunpack.i.l.bf16 %v3634_v41  ;;  %v3667_v41 = vld [vmem:[%s3950_s29 + $0x18] sm:$0xff]  }
 0x528   : > { %v2589_v21 = vsel %vm2587_vm6, %v2586_v36, %v3636_v51  ;;  %v2588_v53 = vsel %vm2587_vm6, %v2585_v27, %v3635_v7 }
 0x52d   : > { %v3639_v60 = vpop.permute.xlu0 %3638 }
 0x52e   : > { %v3641_v14 = vunpack.i.h.bf16 %v3639_v60  ;;  %v3640_v11 = vunpack.i.l.bf16 %v3639_v60 }
 0x530   : > { %v2592_v43 = vsel %vm2590_vm7, %v2589_v21, %v3641_v14  ;;  %v2591_v45 = vsel %vm2590_vm7, %v2588_v53, %v3640_v11  ;;  %v3670_v21 = vld [vmem:[%s3950_s29] sm:$0xff]  }
 0x531   : > { %v3195_v53 = vld [vmem:[%s623_s1] ss:$0 sm:$0xff] }
 0x561   : > { %v3644_v42 = vpop.permute.xlu1 %3643 }
 0x562   : > { %v3646_v2 = vunpack.i.h.bf16 %v3644_v42  ;;  %v3645_v26 = vunpack.i.l.bf16 %v3644_v42 }
 0x564   : > { %v2595_v37 = vsel %vm2593_vm8, %v2592_v43, %v3646_v2  ;;  %v2594_v54 = vsel %vm2593_vm8, %v2591_v45, %v3645_v26 }
 0x56a   : > { %v3649_v46 = vpop.permute.xlu0 %3648 }
 0x56b   : > { %v3651_v18 = vunpack.i.h.bf16 %v3649_v46  ;;  %v3650_v22 = vunpack.i.l.bf16 %v3649_v46  ;;  %v3193_v46 = vld [vmem:[%s4596_s20] ss:$0 sm:$0xff] }
 0x56d   : > { %v2598_v29 = vsel %vm2596_vm9, %v2595_v37, %v3651_v18  ;;  %v2597_v49 = vsel %vm2596_vm9, %v2594_v54, %v3650_v22  ;;  %v3668_v18 = vld [vmem:[%s3950_s29 + $0x10] sm:$0xff]   ;;  %v3669_v22 = vld [vmem:[%s3950_s29 + $0x8] sm:$0xff]  }
 0x572   : > { %v3654_v30 = vpop.permute.xlu1 %3653 }
 0x573   : > { %v3656_v50 = vunpack.i.h.bf16 %v3654_v30  ;;  %v3655_v57 = vunpack.i.l.bf16 %v3654_v30 }
 0x575   : > { %v2601_v52 = vsel %vm2599_vm10, %v2598_v29, %v3656_v50  ;;  %v2600_v31 = vsel %vm2599_vm10, %v2597_v49, %v3655_v57 }
 0x576   : > { %v2602_v1 = vpack.c.bf16 %v2601_v52, %v2600_v31 }
 0x578   : > { %3506 = vmatmul.mubr.msk.bf16.vlgmr.msra.gmra.mxu1 %vm675_vm2, %v2602_v1 }
 0x579   : > { %3533 = vmatprep.mubr.msk.bf16.mxu1 %vm3798_vm1, %v3797_v3  ;;  %3518 = vmatpush3.bf16.msra.mxu1 %v3663_v34 }
 0x57a   : > { %3519 = vmatprep.subr.bf16.mxu1 %v3797_v3 }
 0x57d   : > { %3520 = vmatpush3.bf16.msra.mxu1 %v3664_v35  ;;  %v3209_v35 = vld [vmem:[%s637_s27] ss:$0 sm:$0xff] }
 0x57e   : > { %3521 = vmatprep.subr.bf16.mxu1 %v3797_v3 }
 0x581   : > { %3522 = vmatpush3.bf16.msra.mxu1 %v3665_v38 }
 0x582   : > { %3523 = vmatprep.subr.bf16.mxu1 %v3797_v3 }
 0x585   : > { %3524 = vmatpush3.bf16.msra.mxu1 %v3666_v40 }
 0x586   : > { %3525 = vmatprep.subr.bf16.mxu1 %v3797_v3 }
 0x589   : > { %3526 = vmatpush3.bf16.msra.mxu1 %v3667_v41 }
 0x58a   : > { %3527 = vmatprep.subr.bf16.mxu1 %v3797_v3 }
 0x58d   : > { %3528 = vmatpush3.bf16.msra.mxu1 %v3668_v18 }
 0x58e   : > { %3529 = vmatprep.subr.bf16.mxu1 %v3797_v3 }
 0x591   : > { %3530 = vmatpush3.bf16.msra.mxu1 %v3669_v22 }
 0x592   : > { %3531 = vmatprep.subr.bf16.mxu1 %v3797_v3  ;;  %v3199_v3 = vld [vmem:[%s631_s0] ss:$0 sm:$0xff] }
 0x595   : > { %3532 = vmatpush3.bf16.msra.mxu1 %v3670_v21 }
 0x638   : > { %v2663_v4 = vpop.f32.mrf.mxu1 }
 0x639   : > { %v2664_v5 = vadd.f32 %v3189_v62, %v2663_v4 }
 0x63a   : > { %v3507_v8 = vpop.f32.mrf.mxu1 }
 0x63b   : > { %v2670_v15 = vadd.f32 %v3743_v9, %v2664_v5 }
 0x63c   : > { %v2666_v12 = vpop.f32.mrf.mxu1 }
 0x63d   : > { %v2667_v47 = vadd.f32 %v3189_v62, %v2666_v12  ;;  %v2674_v16 = vsel %vm675_vm2, %v2670_v15, 0.0 }
 0x63e   : > { %2675 = vadd.xlane.f32.xlu0 %v2674_v16  ;;  %v3508_v17 = vpop.f32.mrf.mxu1 }
 0x63f   : > { %v2671_v55 = vadd.f32 %v3744_v19, %v2667_v47 }
 0x641   : > { %v2677_v56 = vsel %vm675_vm2, %v2671_v55, 0.0 }
 0x642   : > { %2678 = vadd.xlane.f32.xlu1 %v2677_v56 }
 0x6c7   : > { %v2676_v6 = vpop.xlane.xlu0 %2675 }
 0x6c8   : > { %v2681_v0 = vmul.f32 0.03125, %v2676_v6 }
 0x6ca   : > { %v2683_v24 = vsub.f32 %v2670_v15, %v2681_v0 }
 0x6cb   : > { %v2679_v25 = vpop.xlane.xlu1 %2678 }
 0x6cc   : > { %v2682_v28 = vmul.f32 0.03125, %v2679_v25  ;;  %v2685_v32 = vmul.f32 %v2683_v24, %v2683_v24 }
 0x6ce   : > { %v2684_v44 = vsub.f32 %v2671_v55, %v2682_v28  ;;  %v2687_v58 = vsel %vm675_vm2, %v2685_v32, 0.0 }
 0x6cf   : > { %2688 = vadd.xlane.f32.xlu0 %v2687_v58 }
 0x6d0   : > { %v2686_v59 = vmul.f32 %v2684_v44, %v2684_v44 }
 0x6d2   : > { %v2690_v13 = vsel %vm675_vm2, %v2686_v59, 0.0 }
 0x6d3   : > { %2691 = vadd.xlane.f32.xlu0 %v2690_v13 }
 0x758   : > { %v2689_v60 = vpop.xlane.xlu0 %2688 }
 0x759   : > { %v2693_v61 = vmul.f32 0.03125, %v2689_v60 }
 0x75b   : > { %v2695_v23 = vadd.f32 1e-05, %v2693_v61 }
 0x75c   : > { %v2692_v10 = vpop.xlane.xlu0 %2691 }
 0x75d   : > { %3735 = vrsqrt.f32 %v2695_v23  ;;  %v2694_v48 = vmul.f32 0.03125, %v2692_v10 }
 0x75f   : > { %v2696_v42 = vadd.f32 1e-05, %v2694_v48 }
 0x761   : > { %3737 = vrsqrt.f32 %v2696_v42 }
 0x76a   : > { %v3736_v51 = vpop.eup %3735 }
 0x76b   : > { %v2699_v7 = vmul.f32 %v3736_v51, %v2683_v24 }
 0x76d   : > { %v2707_v39 = vmul.f32 %v3193_v46, %v2699_v7 }
 0x76e   : > { %v3738_v14 = vpop.eup %3737 }
 0x76f   : > { %v2700_v11 = vmul.f32 %v3738_v14, %v2684_v44  ;;  %v2715_v26 = vadd.f32 %v3194_v20, %v2707_v39 }
 0x771   : > { %v2708_v2 = vmul.f32 %v3193_v46, %v2700_v11 }
 0x773   : > { %v2716_v36 = vadd.f32 %v3194_v20, %v2708_v2 }
 0x775   : > { %v2717_v27 = vpack.c.bf16 %v2716_v36, %v2715_v26 }
 0x777   : > { %3514 = vmatmul.mubr.msk.bf16.vlgmr.msra.gmra.mxu0 %vm675_vm2, %v2717_v27 }
 0x837   : > { %v2778_v43 = vpop.f32.mrf.mxu0 }
 0x838   : > { %v2779_v30 = vadd.f32 %v3195_v53, %v2778_v43 }
 0x839   : > { %v3515_v45 = vpop.f32.mrf.mxu0 }
 0x83a   : > { %v2785_v57 = vmax.f32 %v2779_v30, 0.0 }
 0x83b   : > { %v2781_v37 = vpop.f32.mrf.mxu0 }
 0x83c   : > { %v2782_v54 = vadd.f32 %v3195_v53, %v2781_v37 }
 0x83d   : > { %v3516_v50 = vpop.f32.mrf.mxu0 }
 0x83e   : > { %v2786_v29 = vmax.f32 %v2782_v54, 0.0 }
 0x840   : > { %v2787_v49 = vpack.c.bf16 %v2786_v29, %v2785_v57 }
 0x842   : > { %3534 = vmatmul.mubr.bf16.vlgmr.msra.gmra.mxu1 %v2787_v49 }
 0x902   : > { %v2893_v52 = vpop.f32.mrf.mxu1 }
 0x903   : > { %v2894_v31 = vadd.f32 %v3199_v3, %v2893_v52 }
 0x904   : > { %v3535_v1 = vpop.f32.mrf.mxu1 }
 0x905   : > { %v2900_v62 = vadd.f32 %v2894_v31, %v2715_v26 }
 0x906   : > { %v2896_v4 = vpop.f32.mrf.mxu1 }
 0x907   : > { %v2897_v5 = vadd.f32 %v3199_v3, %v2896_v4  ;;  %v2904_v8 = vsel %vm675_vm2, %v2900_v62, 0.0 }
 0x908   : > { %2905 = vadd.xlane.f32.xlu1 %v2904_v8  ;;  %v3536_v9 = vpop.f32.mrf.mxu1 }
 0x909   : > { %v2901_v15 = vadd.f32 %v2897_v5, %v2716_v36 }
 0x90b   : > { %v2907_v12 = vsel %vm675_vm2, %v2901_v15, 0.0 }
 0x90c   : > { %2908 = vadd.xlane.f32.xlu0 %v2907_v12 }
 0x991   : > { %v2906_v47 = vpop.xlane.xlu1 %2905 }
 0x992   : > { %v2910_v16 = vmul.f32 0.03125, %v2906_v47 }
 0x994   : > { %v2912_v17 = vsub.f32 %v2900_v62, %v2910_v16 }
 0x995   : > { %v2909_v19 = vpop.xlane.xlu0 %2908 }
 0x996   : > { %v2911_v55 = vmul.f32 0.03125, %v2909_v19  ;;  %v2914_v56 = vmul.f32 %v2912_v17, %v2912_v17 }
 0x998   : > { %v2913_v6 = vsub.f32 %v2901_v15, %v2911_v55  ;;  %v2916_v0 = vsel %vm675_vm2, %v2914_v56, 0.0 }
 0x999   : > { %2917 = vadd.xlane.f32.xlu1 %v2916_v0 }
 0x99a   : > { %v2915_v24 = vmul.f32 %v2913_v6, %v2913_v6 }
 0x99c   : > { %v2919_v25 = vsel %vm675_vm2, %v2915_v24, 0.0 }
 0x99d   : > { %2920 = vadd.xlane.f32.xlu0 %v2919_v25 }
 0xa22   : > { %v2918_v28 = vpop.xlane.xlu1 %2917 }
 0xa23   : > { %v2922_v32 = vmul.f32 0.03125, %v2918_v28 }
 0xa25   : > { %v2924_v44 = vadd.f32 1e-05, %v2922_v32 }
 0xa26   : > { %v2921_v58 = vpop.xlane.xlu0 %2920 }
 0xa27   : > { %3739 = vrsqrt.f32 %v2924_v44  ;;  %v2923_v59 = vmul.f32 0.03125, %v2921_v58 }
 0xa29   : > { %v2925_v13 = vadd.f32 1e-05, %v2923_v59 }
 0xa2b   : > { %3741 = vrsqrt.f32 %v2925_v13 }
 0xa34   : > { %v3740_v33 = vpop.eup %3739 }
 0xa35   : > { %v2928_v34 = vmul.f32 %v3740_v33, %v2912_v17 }
 0xa37   : > { %v2936_v38 = vmul.f32 %v3208_v63, %v2928_v34 }
 0xa38   : > { %v3742_v40 = vpop.eup %3741 }
 0xa39   : > { %v2944_v41 = vadd.f32 %v3209_v35, %v2936_v38  ;;  %v2929_v60 = vmul.f32 %v3742_v40, %v2913_v6 }
 0xa3b   : > { %2946 = vst.msk [vmem:[#allocation2] sm:$0xff] %vm675_vm2, %v2944_v41  ;;  %v2937_v61 = vmul.f32 %v3208_v63, %v2929_v60  ;;  %2951 = sbr.rel (%p3210_p6) target bundleno = 2625 (0xa41), region = 80 }
 0xa3d   : > { %v2945_v23 = vadd.f32 %v3209_v35, %v2937_v61 }
 0xa3f   : > { %2947 = vst.msk [vmem:[#allocation2 + $0x8] sm:$0xff] %vm675_vm2, %v2945_v23 }
 0xa40   : > { %2952 = vst.msk [vmem:[#allocation3] sm:$0xff] %vm675_vm2, %v2944_v41  ;;  %2953 = vst.msk [vmem:[#allocation3 + $0x8] sm:$0xff] %vm675_vm2, %v2945_v23 }
 0xa41 PF: > { %s4598_s30 = sld [smem:[#allocation7_spill]]  ;;  %s3815_s3 = smov [#allocation3]  }
 0xa42   : > { %s2963_s19 = sshll.u32 %s3815_s3, 4  ;;  %s2964_s19 = int_to_ptr.vmem [resolvable:$true] %s2963_s19 }
 0xa43   : > { %s3745_s24 = scalar_lea.vmem %s2964_s19, 256  ;;  %p3752_p11 = scmp.lt.s32.totalorder %s2964_s19, %s2964_s19 }
 0xa44   : > { %p3746_p8 = scmp.ne.s32.totalorder %s2964_s19, %s3745_s24  ;;  %p3753_p12 = scmp.lt.s32.totalorder %s3745_s24, %s3745_s24 }
 0xa46   : > { %p3754_p13 = por %p3753_p12, %p3752_p11 }
 0xa47   : > { %s4599_s27 = sadd.s32 4294967295, %s4598_s30  }
 0xa48   : > { %p4542_p7 = scmp.eq.s32.totalorder %s4599_s27, 1 }
 0xa4a   : > { %p3747_p9 = pnand %p3746_p8, %p4542_p7 }
 0xa4c   : > { %p3748_p10 = pneg %p3747_p9 }
 0xa4e   : > { %p3755_p0 = pnand %p3754_p13, %p3748_p10 }
 0xa50   : > { %3758 = shalt.err (!%p3755_p0)
}
 0xa51   : > { %s3816_s25 = smov 128   ;;  %s4601_s26 = sld [smem:[#allocation12_spill]] }
 0xa57   : > { %3538 = dma.vmem_to_hbm [thread:$0]  (%p4542_p7), %s2964_s19, 256, %s4601_s26, [#allocation4], %s3816_s25, %s3816_s25, %s3809_s13  }
 0xa58   : > { %3782 = dma.done.wait (%p4542_p7), [#allocation4], 256  }
 0xa59   : > { %3784 = vsyncadd (%p4542_p7), [#allocation4], 4294967040 }
 0xa5a PF: > { %s4602_s15 = sld [smem:[#allocation7_spill]] }
 0xa5b   : > { %s4603_s25 = sld [smem:[#allocation6_spill]] }
 0xa5c   : > { %s4604_s26 = sld [smem:[#allocation8_spill]] }
 0xa60   : > { %s24_s27 = sadd.s32 1, %s4602_s15  }
 0xa61   : > { %p21_p1 = scmp.ge.s32.totalorder %s24_s27, 4  }
 0xa63   :  { %23 = sbr.rel (!%p21_p1) target bundleno = 7 (0x7), region = 144 }
 0xa68   :  { %2979 = vsyncpa [#allocation4], 1 }
 0xa69   :  { %2981 = vsyncpa [#allocation4 + $0x1], 1 }

</bundles_post_ra>
